<compile_context>
chip_gen: v7x
topology: tpu7x:2x2x1
jax: 0.10.0
libtpu: 0.0.40
codegen_flags: <defaults>
</compile_context>

<pallas_src>
import functools

import jax
import jax.numpy as jnp
import numpy as np
from jax import lax
from jax.experimental import pallas as pl
from jax.experimental.pallas import tpu as pltpu

EPS = 1e-5


# ------------------------------- kernel -------------------------------------

def _bn_scale_offset(y, gamma, beta, inv_m):
    """Training-mode BatchNorm folded into one per-channel scale/offset.

    y     : (C, N*HW) float32 conv output (all images concatenated on lanes).
    gamma : (C, 1) float32,  beta : (C, 1) float32.
    inv_m : python float, 1 / (N * H * W).

    Two-pass form (mean first, then centered sum of squares) in f32: avoids the
    E[x^2]-E[x]^2 catastrophic cancellation.  Biased variance, like
    nn.BatchNorm2d in training mode.  rsqrt runs on the EUP slot.
    """
    mean = y.sum(axis=1, keepdims=True) * inv_m
    d = y - mean
    var = (d * d).sum(axis=1, keepdims=True) * inv_m
    a = gamma * lax.rsqrt(var + EPS)
    b = beta - mean * a
    return a, b


def bottleneck_kernel(x_ref, w1_ref, t2_ref, mask_ref, w3_ref,
                      g1_ref, b1_ref, g2_ref, b2_ref, g3_ref, b3_ref,
                      o_ref, stack_ref, *, width, w_img):
    """Fused BottleNeck forward.  Layout: channels-first (C, N*H*W) slab.

    x_ref    : (Cin, N*HW)      f32   -- residual + conv1 input (lane-dense)
    w1/w3    : (width,Cin)/(cout,width)  -- 1x1 conv matrices (matmul dtype)
    t2       : (width, 9*width)        -- packed per-tap channel matrices
                                          (grouped block-diagonal baked in)
    mask     : (9, N*HW)        f32   -- per-tap 0/1 masks: padding=1 zeros,
                                          row/image roll-wraps zeroed
    g*/b*    : (C, 1)           f32   -- BatchNorm affine params
    o_ref    : (cout, N*HW)     f32
    stack_ref: (9*width, N*HW)  matmul-dtype VMEM scratch (stacked taps, K-axis)
    """
    mmdt = w1_ref.dtype                    # matmul operand dtype (f32 / bf16)
    nhw = x_ref.shape[1]
    inv_m = 1.0 / float(nhw)

    x = x_ref[...]                                            # (Cin, N*HW) f32

    # ---- conv1 (1x1): ONE (width,Cin)@(Cin,N*HW) matmul; input cast once ----
    y1 = jnp.dot(w1_ref[...], x.astype(mmdt),
                 preferred_element_type=jnp.float32)          # (width, N*HW)
    a1, b1 = _bn_scale_offset(y1, g1_ref[...], b1_ref[...], inv_m)
    act1 = jnp.maximum(y1 * a1 + b1, 0.0)                     # bn1 + relu, f32

    # ---- conv2 (3x3 grouped, pad=1): per-tap XLU roll + VPU mask, then ONE
    # ---- K = 9*width matmul over the stacked taps -----------------------------
    for t in range(9):
        dy, dx = divmod(t, 3)
        s = (dy - 1) * w_img + (dx - 1)    # flat source offset of this tap
        if s == 0:
            tap = act1                     # center tap: no shift, mask all-ones
        else:
            # shifted[p] = act1[(p + s) mod nhw]; padding / row-wrap /
            # image-wrap destinations are zeroed by the precomputed mask.
            tap = pltpu.roll(act1, (-s) % nhw, axis=1) * mask_ref[t:t + 1, :]
        stack_ref[t * width:(t + 1) * width, :] = tap.astype(mmdt)
    y2 = jnp.dot(t2_ref[...], stack_ref[...],
                 preferred_element_type=jnp.float32)          # (width, N*HW)
    a2, b2 = _bn_scale_offset(y2, g2_ref[...], b2_ref[...], inv_m)
    act2 = jnp.maximum(y2 * a2 + b2, 0.0)                     # bn2 + relu, f32

    # ---- conv3 (1x1) + bn3 + residual add + relu ----------------------------
    z3 = jnp.dot(w3_ref[...], act2.astype(mmdt),
                 preferred_element_type=jnp.float32)          # (cout, N*HW)
    a3, b3 = _bn_scale_offset(z3, g3_ref[...], b3_ref[...], inv_m)
    o_ref[...] = jnp.maximum(z3 * a3 + b3 + x, 0.0)


# ------------------------------ wrapper --------------------------------------

def init_params(key, inplanes, planes, groups, base_width):
    width = int(planes * (base_width / 64.0)) * groups
    cout = planes * 4  # expansion = 4
    assert width == cout, (
        "bn3 = BatchNorm2d(width) only runs when width == planes*expansion")
    ks = jax.random.split(key, 9)
    return {
        "w1": 0.1 * jax.random.normal(ks[0], (width, inplanes, 1, 1), jnp.float32),
        "w2": 0.1 * jax.random.normal(ks[1], (width, width // groups, 3, 3), jnp.float32),
        "w3": 0.1 * jax.random.normal(ks[2], (cout, width, 1, 1), jnp.float32),
        "g1": 1.0 + 0.1 * jax.random.normal(ks[3], (width,), jnp.float32),
        "b1": 0.1 * jax.random.normal(ks[4], (width,), jnp.float32),
        "g2": 1.0 + 0.1 * jax.random.normal(ks[5], (width,), jnp.float32),
        "b2": 0.1 * jax.random.normal(ks[6], (width,), jnp.float32),
        "g3": 1.0 + 0.1 * jax.random.normal(ks[7], (cout,), jnp.float32),
        "b3": 0.1 * jax.random.normal(ks[8], (cout,), jnp.float32),
    }


def prepare_params(p, groups, n_img, H, W, mm_dtype=jnp.float32):
    """One-time host-side weight packing (hoisted out of the forward path).

    - w1 / w3 : (Cout, Cin) 1x1 conv matrices for channels-first matmul.
    - t2      : (width, 9*width) packed per-tap channel matrices [co, t*width+ci]
                with the grouped-conv block-diagonal structure baked in, so the
                kernel does ONE K=9*width matmul for conv2.
    - mask    : (9, N*HW) 0/1 per-tap masks: padding=1 boundary zeros, and
                (because the kernel uses a cyclic pltpu.roll over the whole
                lane axis) row-wrap and image-wrap positions zeroed too.
    - gamma/beta reshaped to (C, 1) columns (channels-first broadcast).
    """
    width = p["w1"].shape[0]
    cout = p["w3"].shape[0]
    assert width == cout, "requires width == planes*expansion (bn3 constraint)"
    cg = width // groups

    w1 = np.asarray(p["w1"])[:, :, 0, 0]           # (width, inplanes)
    w3 = np.asarray(p["w3"])[:, :, 0, 0]           # (cout, width)
    w2 = np.asarray(p["w2"])                       # (width, cg, 3, 3)

    t2 = np.zeros((width, 9 * width), np.float32)  # [co, t*width + ci]
    for co in range(width):
        g = co // cg
        for t in range(9):
            dy, dx = divmod(t, 3)
            t2[co, t * width + g * cg: t * width + (g + 1) * cg] = w2[co, :, dy, dx]

    hw = H * W
    mask = np.zeros((9, hw), np.float32)           # [tap, dst_pixel]
    for t in range(9):
        dy, dx = divmod(t, 3)
        for y in range(H):
            ys = y + dy - 1
            for x in range(W):
                xs = x + dx - 1
                if 0 <= ys < H and 0 <= xs < W:
                    mask[t, y * W + x] = 1.0
    mask = np.tile(mask, (1, n_img))               # (9, N*HW) -- per-image copy

    col = lambda v: jnp.asarray(np.asarray(v).reshape(-1, 1), jnp.float32)
    return {
        "w1": jnp.asarray(w1, mm_dtype),
        "t2": jnp.asarray(t2, mm_dtype),
        "mask": jnp.asarray(mask, jnp.float32),    # 0/1, VPU multiply in f32
        "w3": jnp.asarray(w3, mm_dtype),
        "g1": col(p["g1"]), "b1": col(p["b1"]),
        "g2": col(p["g2"]), "b2": col(p["b2"]),
        "g3": col(p["g3"]), "b3": col(p["b3"]),
    }


def bottleneck_forward(x_nchw, prep):
    N, Cin, H, W = x_nchw.shape
    width = prep["w1"].shape[0]
    cout = prep["w3"].shape[0]
    hw = H * W
    assert Cin == cout, "identity residual requires inplanes == planes*expansion"
    mm_dtype = prep["w1"].dtype

    # NCHW -> (Cin, N*HW): channels on sublanes, images concatenated along the
    # lane axis so each 1x1 conv is ONE matmul and each BN is ONE reduction.
    # Lane-dense (N*HW >= 128) -> unmasked vld/vst.
    x_slab = jnp.transpose(x_nchw, (1, 0, 2, 3)).reshape(Cin, N * hw)
    x_slab = x_slab.astype(jnp.float32)

    kernel = functools.partial(bottleneck_kernel, width=width, w_img=W)
    vmem = pl.BlockSpec(memory_space=pltpu.MemorySpace.VMEM)

    out_slab = pl.pallas_call(
        kernel,
        out_shape=jax.ShapeDtypeStruct((cout, N * hw), jnp.float32),
        in_specs=[vmem] * 11,
        out_specs=vmem,
        scratch_shapes=[pltpu.VMEM((9 * width, N * hw), mm_dtype)],
        compiler_params=pltpu.CompilerParams(
            # working set is well under 1 MiB; request a modest scoped budget
            # so surrounding XLA fusions keep their VMEM on every generation.
            vmem_limit_bytes=8 * 1024 * 1024),
    )(x_slab, prep["w1"], prep["t2"], prep["mask"], prep["w3"],
      prep["g1"], prep["b1"], prep["g2"], prep["b2"], prep["g3"], prep["b3"])

    # (cout, N*HW) -> NCHW.
    return out_slab.reshape(cout, N, H, W).transpose(1, 0, 2, 3)


# --------------------------- plain-JAX reference -----------------------------

def reference_forward(x, p, groups):
    def conv(x, w, fg=1, pad=0):
        return jax.lax.conv_general_dilated(
            x, w, window_strides=(1, 1), padding=[(pad, pad), (pad, pad)],
            feature_group_count=fg,
            dimension_numbers=("NCHW", "OIHW", "NCHW"))

    def bn(y, gamma, beta):
        mean = y.mean(axis=(0, 2, 3), keepdims=True)
        var = ((y - mean) ** 2).mean(axis=(0, 2, 3), keepdims=True)
        return ((y - mean) / jnp.sqrt(var + EPS)
                * gamma.reshape(1, -1, 1, 1) + beta.reshape(1, -1, 1, 1))

    out = jax.nn.relu(bn(conv(x, p["w1"]), p["g1"], p["b1"]))
    out = jax.nn.relu(bn(conv(out, p["w2"], fg=groups, pad=1), p["g2"], p["b2"]))
    out = bn(conv(out, p["w3"]), p["g3"], p["b3"])
    return jax.nn.relu(out + x)


# ---------------------------------- main --------------------------------------

if __name__ == "__main__":
    key = jax.random.PRNGKey(0)
    kx, kp = jax.random.split(key)

    # BottleNeck(inplanes=16, planes=4, groups=4, base_width=64)
    #   -> width = 16, out channels = planes*4 = 16 = inplanes (identity add OK).
    inplanes, planes, groups, base_width = 16, 4, 4, 64
    N, H, W = 2, 16, 16                     # N*H*W = 512 -> lane-dense slabs

    x = jax.random.normal(kx, (N, inplanes, H, W), jnp.float32)
    params = init_params(kp, inplanes, planes, groups, base_width)
    ref = reference_forward(x, params, groups)

    fwd = jax.jit(bottleneck_forward)

    # 1) f32 matmuls: matches the PyTorch (f32) module semantics tightly.
    prep_f32 = prepare_params(params, groups, N, H, W, mm_dtype=jnp.float32)
    out_f32 = jax.block_until_ready(fwd(x, prep_f32))
    assert out_f32.shape == (N, planes * 4, H, W)
    np.testing.assert_allclose(np.asarray(out_f32), np.asarray(ref),
                               rtol=1e-4, atol=1e-4)

    # 2) bf16 matmul operands (f32 accumulation, f32 BN statistics and f32
    #    elementwise): recommended production configuration on v6e/v7x; only
    #    operand-quantization error relative to the f32 reference.
    prep_bf16 = prepare_params(params, groups, N, H, W, mm_dtype=jnp.bfloat16)
    out_bf16 = jax.block_until_ready(fwd(x, prep_bf16))
    np.testing.assert_allclose(np.asarray(out_bf16), np.asarray(ref),
                               rtol=5e-2, atol=5e-2)

    print("KERNEL_OK")
</pallas_src>

<mosaic_0001>
module attributes {stable_mosaic.version = 11 : i64} {
  func.func @bottleneck_kernel(%arg0: memref<16x512xf32, #tpu.memory_space<vmem>>, %arg1: memref<16x16xf32, #tpu.memory_space<vmem>>, %arg2: memref<16x144xf32, #tpu.memory_space<vmem>>, %arg3: memref<9x512xf32, #tpu.memory_space<vmem>>, %arg4: memref<16x16xf32, #tpu.memory_space<vmem>>, %arg5: memref<16x1xf32, #tpu.memory_space<vmem>>, %arg6: memref<16x1xf32, #tpu.memory_space<vmem>>, %arg7: memref<16x1xf32, #tpu.memory_space<vmem>>, %arg8: memref<16x1xf32, #tpu.memory_space<vmem>>, %arg9: memref<16x1xf32, #tpu.memory_space<vmem>>, %arg10: memref<16x1xf32, #tpu.memory_space<vmem>>, %arg11: memref<16x512xf32, #tpu.memory_space<vmem>>, %arg12: memref<144x512xf32, #tpu.memory_space<vmem>>) attributes {dimension_semantics = [], scalar_prefetch = 0 : i64, scratch_operands = 1 : i64, tpu.core_type = #tpu.core_type<tc>} {
    %c0 = arith.constant 0 : index
    %c0_0 = arith.constant 0 : index
    %0 = vector.load %arg0[%c0, %c0_0] : memref<16x512xf32, #tpu.memory_space<vmem>>, vector<16x512xf32>
    %c0_1 = arith.constant 0 : index
    %c0_2 = arith.constant 0 : index
    %1 = vector.load %arg1[%c0_1, %c0_2] : memref<16x16xf32, #tpu.memory_space<vmem>>, vector<16x16xf32>
    %cst = arith.constant dense<0.000000e+00> : vector<16x512xf32>
    %2 = tpu.matmul %1, %0, %cst {dimension_numbers = #tpu.dot_dimension_numbers<[1], [0], [0], [1], [0, 0, 1, 1], [], []>} : vector<16x16xf32>, vector<16x512xf32>, vector<16x512xf32> -> vector<16x512xf32>
    %c0_3 = arith.constant 0 : index
    %c0_4 = arith.constant 0 : index
    %3 = vector.load %arg5[%c0_3, %c0_4] : memref<16x1xf32, #tpu.memory_space<vmem>>, vector<16x1xf32>
    %c0_5 = arith.constant 0 : index
    %c0_6 = arith.constant 0 : index
    %4 = vector.load %arg6[%c0_5, %c0_6] : memref<16x1xf32, #tpu.memory_space<vmem>>, vector<16x1xf32>
    %cst_7 = arith.constant dense<0.000000e+00> : vector<16xf32>
    %5 = vector.multi_reduction <add>, %2, %cst_7 [1] : vector<16x512xf32> to vector<16xf32>
    %6 = vector.shape_cast %5 : vector<16xf32> to vector<16x1xf32>
    %cst_8 = arith.constant 0.001953125 : f32
    %7 = vector.broadcast %cst_8 : f32 to vector<16x1xf32>
    %8 = arith.mulf %6, %7 : vector<16x1xf32>
    %9 = vector.broadcast %8 : vector<16x1xf32> to vector<16x512xf32>
    %10 = arith.subf %2, %9 : vector<16x512xf32>
    %11 = arith.mulf %10, %10 : vector<16x512xf32>
    %cst_9 = arith.constant dense<0.000000e+00> : vector<16xf32>
    %12 = vector.multi_reduction <add>, %11, %cst_9 [1] : vector<16x512xf32> to vector<16xf32>
    %13 = vector.shape_cast %12 : vector<16xf32> to vector<16x1xf32>
    %cst_10 = arith.constant 0.001953125 : f32
    %14 = vector.broadcast %cst_10 : f32 to vector<16x1xf32>
    %15 = arith.mulf %13, %14 : vector<16x1xf32>
    %cst_11 = arith.constant 9.99999974E-6 : f32
    %16 = vector.broadcast %cst_11 : f32 to vector<16x1xf32>
    %17 = arith.addf %15, %16 : vector<16x1xf32>
    %18 = math.rsqrt %17 : vector<16x1xf32>
    %19 = arith.mulf %3, %18 : vector<16x1xf32>
    %20 = arith.mulf %8, %19 : vector<16x1xf32>
    %21 = arith.subf %4, %20 : vector<16x1xf32>
    %22 = vector.broadcast %19 : vector<16x1xf32> to vector<16x512xf32>
    %23 = arith.mulf %2, %22 : vector<16x512xf32>
    %24 = vector.broadcast %21 : vector<16x1xf32> to vector<16x512xf32>
    %25 = arith.addf %23, %24 : vector<16x512xf32>
    %cst_12 = arith.constant 0.000000e+00 : f32
    %26 = vector.broadcast %cst_12 : f32 to vector<16x512xf32>
    %27 = arith.maximumf %25, %26 : vector<16x512xf32>
    %c17_i32 = arith.constant 17 : i32
    %28 = tpu.dynamic_rotate %27 by %c17_i32 dim 1 : vector<16x512xf32>, i32 -> vector<16x512xf32>
    %c0_13 = arith.constant 0 : index
    %c0_14 = arith.constant 0 : index
    %29 = vector.load %arg3[%c0_13, %c0_14] : memref<9x512xf32, #tpu.memory_space<vmem>>, vector<1x512xf32>
    %30 = vector.broadcast %29 : vector<1x512xf32> to vector<16x512xf32>
    %31 = arith.mulf %28, %30 : vector<16x512xf32>
    %c0_15 = arith.constant 0 : index
    %c0_16 = arith.constant 0 : index
    %32 = vector.load %arg12[%c0_15, %c0_16] : memref<144x512xf32, #tpu.memory_space<vmem>>, vector<16x512xf32>
    tpu.vector_store %arg12[%c0_15, %c0_16], %31 {strides = array<i32>} : memref<144x512xf32, #tpu.memory_space<vmem>>, vector<16x512xf32>,
    %c16_i32 = arith.constant 16 : i32
    %33 = tpu.dynamic_rotate %27 by %c16_i32 dim 1 : vector<16x512xf32>, i32 -> vector<16x512xf32>
    %c1 = arith.constant 1 : index
    %c0_17 = arith.constant 0 : index
    %34 = vector.load %arg3[%c1, %c0_17] : memref<9x512xf32, #tpu.memory_space<vmem>>, vector<1x512xf32>
    %35 = vector.broadcast %34 : vector<1x512xf32> to vector<16x512xf32>
    %36 = arith.mulf %33, %35 : vector<16x512xf32>
    %c16 = arith.constant 16 : index
    %c0_18 = arith.constant 0 : index
    %37 = vector.load %arg12[%c16, %c0_18] : memref<144x512xf32, #tpu.memory_space<vmem>>, vector<16x512xf32>
    tpu.vector_store %arg12[%c16, %c0_18], %36 {strides = array<i32>} : memref<144x512xf32, #tpu.memory_space<vmem>>, vector<16x512xf32>,
    %c15_i32 = arith.constant 15 : i32
    %38 = tpu.dynamic_rotate %27 by %c15_i32 dim 1 : vector<16x512xf32>, i32 -> vector<16x512xf32>
    %c2 = arith.constant 2 : index
    %c0_19 = arith.constant 0 : index
    %39 = vector.load %arg3[%c2, %c0_19] : memref<9x512xf32, #tpu.memory_space<vmem>>, vector<1x512xf32>
    %40 = vector.broadcast %39 : vector<1x512xf32> to vector<16x512xf32>
    %41 = arith.mulf %38, %40 : vector<16x512xf32>
    %c32 = arith.constant 32 : index
    %c0_20 = arith.constant 0 : index
    %42 = vector.load %arg12[%c32, %c0_20] : memref<144x512xf32, #tpu.memory_space<vmem>>, vector<16x512xf32>
    tpu.vector_store %arg12[%c32, %c0_20], %41 {strides = array<i32>} : memref<144x512xf32, #tpu.memory_space<vmem>>, vector<16x512xf32>,
    %c1_i32 = arith.constant 1 : i32
    %43 = tpu.dynamic_rotate %27 by %c1_i32 dim 1 : vector<16x512xf32>, i32 -> vector<16x512xf32>
    %c3 = arith.constant 3 : index
    %c0_21 = arith.constant 0 : index
    %44 = vector.load %arg3[%c3, %c0_21] : memref<9x512xf32, #tpu.memory_space<vmem>>, vector<1x512xf32>
    %45 = vector.broadcast %44 : vector<1x512xf32> to vector<16x512xf32>
    %46 = arith.mulf %43, %45 : vector<16x512xf32>
    %c48 = arith.constant 48 : index
    %c0_22 = arith.constant 0 : index
    %47 = vector.load %arg12[%c48, %c0_22] : memref<144x512xf32, #tpu.memory_space<vmem>>, vector<16x512xf32>
    tpu.vector_store %arg12[%c48, %c0_22], %46 {strides = array<i32>} : memref<144x512xf32, #tpu.memory_space<vmem>>, vector<16x512xf32>,
    %c64 = arith.constant 64 : index
    %c0_23 = arith.constant 0 : index
    %48 = vector.load %arg12[%c64, %c0_23] : memref<144x512xf32, #tpu.memory_space<vmem>>, vector<16x512xf32>
    tpu.vector_store %arg12[%c64, %c0_23], %27 {strides = array<i32>} : memref<144x512xf32, #tpu.memory_space<vmem>>, vector<16x512xf32>,
    %c511_i32 = arith.constant 511 : i32
    %49 = tpu.dynamic_rotate %27 by %c511_i32 dim 1 : vector<16x512xf32>, i32 -> vector<16x512xf32>
    %c5 = arith.constant 5 : index
    %c0_24 = arith.constant 0 : index
    %50 = vector.load %arg3[%c5, %c0_24] : memref<9x512xf32, #tpu.memory_space<vmem>>, vector<1x512xf32>
    %51 = vector.broadcast %50 : vector<1x512xf32> to vector<16x512xf32>
    %52 = arith.mulf %49, %51 : vector<16x512xf32>
    %c80 = arith.constant 80 : index
    %c0_25 = arith.constant 0 : index
    %53 = vector.load %arg12[%c80, %c0_25] : memref<144x512xf32, #tpu.memory_space<vmem>>, vector<16x512xf32>
    tpu.vector_store %arg12[%c80, %c0_25], %52 {strides = array<i32>} : memref<144x512xf32, #tpu.memory_space<vmem>>, vector<16x512xf32>,
    %c497_i32 = arith.constant 497 : i32
    %54 = tpu.dynamic_rotate %27 by %c497_i32 dim 1 : vector<16x512xf32>, i32 -> vector<16x512xf32>
    %c6 = arith.constant 6 : index
    %c0_26 = arith.constant 0 : index
    %55 = vector.load %arg3[%c6, %c0_26] : memref<9x512xf32, #tpu.memory_space<vmem>>, vector<1x512xf32>
    %56 = vector.broadcast %55 : vector<1x512xf32> to vector<16x512xf32>
    %57 = arith.mulf %54, %56 : vector<16x512xf32>
    %c96 = arith.constant 96 : index
    %c0_27 = arith.constant 0 : index
    %58 = vector.load %arg12[%c96, %c0_27] : memref<144x512xf32, #tpu.memory_space<vmem>>, vector<16x512xf32>
    tpu.vector_store %arg12[%c96, %c0_27], %57 {strides = array<i32>} : memref<144x512xf32, #tpu.memory_space<vmem>>, vector<16x512xf32>,
    %c496_i32 = arith.constant 496 : i32
    %59 = tpu.dynamic_rotate %27 by %c496_i32 dim 1 : vector<16x512xf32>, i32 -> vector<16x512xf32>
    %c7 = arith.constant 7 : index
    %c0_28 = arith.constant 0 : index
    %60 = vector.load %arg3[%c7, %c0_28] : memref<9x512xf32, #tpu.memory_space<vmem>>, vector<1x512xf32>
    %61 = vector.broadcast %60 : vector<1x512xf32> to vector<16x512xf32>
    %62 = arith.mulf %59, %61 : vector<16x512xf32>
    %c112 = arith.constant 112 : index
    %c0_29 = arith.constant 0 : index
    %63 = vector.load %arg12[%c112, %c0_29] : memref<144x512xf32, #tpu.memory_space<vmem>>, vector<16x512xf32>
    tpu.vector_store %arg12[%c112, %c0_29], %62 {strides = array<i32>} : memref<144x512xf32, #tpu.memory_space<vmem>>, vector<16x512xf32>,
    %c495_i32 = arith.constant 495 : i32
    %64 = tpu.dynamic_rotate %27 by %c495_i32 dim 1 : vector<16x512xf32>, i32 -> vector<16x512xf32>
    %c8 = arith.constant 8 : index
    %c0_30 = arith.constant 0 : index
    %65 = vector.load %arg3[%c8, %c0_30] : memref<9x512xf32, #tpu.memory_space<vmem>>, vector<1x512xf32>
    %66 = vector.broadcast %65 : vector<1x512xf32> to vector<16x512xf32>
    %67 = arith.mulf %64, %66 : vector<16x512xf32>
    %c128 = arith.constant 128 : index
    %c0_31 = arith.constant 0 : index
    %68 = vector.load %arg12[%c128, %c0_31] : memref<144x512xf32, #tpu.memory_space<vmem>>, vector<16x512xf32>
    tpu.vector_store %arg12[%c128, %c0_31], %67 {strides = array<i32>} : memref<144x512xf32, #tpu.memory_space<vmem>>, vector<16x512xf32>,
    %c0_32 = arith.constant 0 : index
    %c0_33 = arith.constant 0 : index
    %69 = vector.load %arg2[%c0_32, %c0_33] : memref<16x144xf32, #tpu.memory_space<vmem>>, vector<16x144xf32>
    %c0_34 = arith.constant 0 : index
    %c0_35 = arith.constant 0 : index
    %70 = vector.load %arg12[%c0_34, %c0_35] : memref<144x512xf32, #tpu.memory_space<vmem>>, vector<144x512xf32>
    %cst_36 = arith.constant dense<0.000000e+00> : vector<16x512xf32>
    %71 = tpu.matmul %69, %70, %cst_36 {dimension_numbers = #tpu.dot_dimension_numbers<[1], [0], [0], [1], [0, 0, 1, 1], [], []>} : vector<16x144xf32>, vector<144x512xf32>, vector<16x512xf32> -> vector<16x512xf32>
    %c0_37 = arith.constant 0 : index
    %c0_38 = arith.constant 0 : index
    %72 = vector.load %arg7[%c0_37, %c0_38] : memref<16x1xf32, #tpu.memory_space<vmem>>, vector<16x1xf32>
    %c0_39 = arith.constant 0 : index
    %c0_40 = arith.constant 0 : index
    %73 = vector.load %arg8[%c0_39, %c0_40] : memref<16x1xf32, #tpu.memory_space<vmem>>, vector<16x1xf32>
    %cst_41 = arith.constant dense<0.000000e+00> : vector<16xf32>
    %74 = vector.multi_reduction <add>, %71, %cst_41 [1] : vector<16x512xf32> to vector<16xf32>
    %75 = vector.shape_cast %74 : vector<16xf32> to vector<16x1xf32>
    %cst_42 = arith.constant 0.001953125 : f32
    %76 = vector.broadcast %cst_42 : f32 to vector<16x1xf32>
    %77 = arith.mulf %75, %76 : vector<16x1xf32>
    %78 = vector.broadcast %77 : vector<16x1xf32> to vector<16x512xf32>
    %79 = arith.subf %71, %78 : vector<16x512xf32>
    %80 = arith.mulf %79, %79 : vector<16x512xf32>
    %cst_43 = arith.constant dense<0.000000e+00> : vector<16xf32>
    %81 = vector.multi_reduction <add>, %80, %cst_43 [1] : vector<16x512xf32> to vector<16xf32>
    %82 = vector.shape_cast %81 : vector<16xf32> to vector<16x1xf32>
    %cst_44 = arith.constant 0.001953125 : f32
    %83 = vector.broadcast %cst_44 : f32 to vector<16x1xf32>
    %84 = arith.mulf %82, %83 : vector<16x1xf32>
    %cst_45 = arith.constant 9.99999974E-6 : f32
    %85 = vector.broadcast %cst_45 : f32 to vector<16x1xf32>
    %86 = arith.addf %84, %85 : vector<16x1xf32>
    %87 = math.rsqrt %86 : vector<16x1xf32>
    %88 = arith.mulf %72, %87 : vector<16x1xf32>
    %89 = arith.mulf %77, %88 : vector<16x1xf32>
    %90 = arith.subf %73, %89 : vector<16x1xf32>
    %91 = vector.broadcast %88 : vector<16x1xf32> to vector<16x512xf32>
    %92 = arith.mulf %71, %91 : vector<16x512xf32>
    %93 = vector.broadcast %90 : vector<16x1xf32> to vector<16x512xf32>
    %94 = arith.addf %92, %93 : vector<16x512xf32>
    %cst_46 = arith.constant 0.000000e+00 : f32
    %95 = vector.broadcast %cst_46 : f32 to vector<16x512xf32>
    %96 = arith.maximumf %94, %95 : vector<16x512xf32>
    %c0_47 = arith.constant 0 : index
    %c0_48 = arith.constant 0 : index
    %97 = vector.load %arg4[%c0_47, %c0_48] : memref<16x16xf32, #tpu.memory_space<vmem>>, vector<16x16xf32>
    %cst_49 = arith.constant dense<0.000000e+00> : vector<16x512xf32>
    %98 = tpu.matmul %97, %96, %cst_49 {dimension_numbers = #tpu.dot_dimension_numbers<[1], [0], [0], [1], [0, 0, 1, 1], [], []>} : vector<16x16xf32>, vector<16x512xf32>, vector<16x512xf32> -> vector<16x512xf32>
    %c0_50 = arith.constant 0 : index
    %c0_51 = arith.constant 0 : index
    %99 = vector.load %arg9[%c0_50, %c0_51] : memref<16x1xf32, #tpu.memory_space<vmem>>, vector<16x1xf32>
    %c0_52 = arith.constant 0 : index
    %c0_53 = arith.constant 0 : index
    %100 = vector.load %arg10[%c0_52, %c0_53] : memref<16x1xf32, #tpu.memory_space<vmem>>, vector<16x1xf32>
    %cst_54 = arith.constant dense<0.000000e+00> : vector<16xf32>
    %101 = vector.multi_reduction <add>, %98, %cst_54 [1] : vector<16x512xf32> to vector<16xf32>
    %102 = vector.shape_cast %101 : vector<16xf32> to vector<16x1xf32>
    %cst_55 = arith.constant 0.001953125 : f32
    %103 = vector.broadcast %cst_55 : f32 to vector<16x1xf32>
    %104 = arith.mulf %102, %103 : vector<16x1xf32>
    %105 = vector.broadcast %104 : vector<16x1xf32> to vector<16x512xf32>
    %106 = arith.subf %98, %105 : vector<16x512xf32>
    %107 = arith.mulf %106, %106 : vector<16x512xf32>
    %cst_56 = arith.constant dense<0.000000e+00> : vector<16xf32>
    %108 = vector.multi_reduction <add>, %107, %cst_56 [1] : vector<16x512xf32> to vector<16xf32>
    %109 = vector.shape_cast %108 : vector<16xf32> to vector<16x1xf32>
    %cst_57 = arith.constant 0.001953125 : f32
    %110 = vector.broadcast %cst_57 : f32 to vector<16x1xf32>
    %111 = arith.mulf %109, %110 : vector<16x1xf32>
    %cst_58 = arith.constant 9.99999974E-6 : f32
    %112 = vector.broadcast %cst_58 : f32 to vector<16x1xf32>
    %113 = arith.addf %111, %112 : vector<16x1xf32>
    %114 = math.rsqrt %113 : vector<16x1xf32>
    %115 = arith.mulf %99, %114 : vector<16x1xf32>
    %116 = arith.mulf %104, %115 : vector<16x1xf32>
    %117 = arith.subf %100, %116 : vector<16x1xf32>
    %118 = vector.broadcast %115 : vector<16x1xf32> to vector<16x512xf32>
    %119 = arith.mulf %98, %118 : vector<16x512xf32>
    %120 = vector.broadcast %117 : vector<16x1xf32> to vector<16x512xf32>
    %121 = arith.addf %119, %120 : vector<16x512xf32>
    %122 = arith.addf %121, %0 : vector<16x512xf32>
    %cst_59 = arith.constant 0.000000e+00 : f32
    %123 = vector.broadcast %cst_59 : f32 to vector<16x512xf32>
    %124 = arith.maximumf %122, %123 : vector<16x512xf32>
    %c0_60 = arith.constant 0 : index
    %c0_61 = arith.constant 0 : index
    %125 = vector.load %arg11[%c0_60, %c0_61] : memref<16x512xf32, #tpu.memory_space<vmem>>, vector<16x512xf32>
    tpu.vector_store %arg11[%c0_60, %c0_61], %124 {strides = array<i32>} : memref<16x512xf32, #tpu.memory_space<vmem>>, vector<16x512xf32>,
    return
  }
}

</mosaic_0001>

<bundles_post_ra>
// kernel: bottleneck_forward.1
= control target key start
LH: loop header
LB: loop body
LE: loop exit
PB: predicated region body
PF: predicated region fallthrough
CT: control target
= control target key end

     0   :  { %v2547_v3 = vmov 0.0   ;;  %vm48_vm0 = vcmask 130048   ;;  %v1582_v55 = vmov 0   ;;  %s1584_s26 = smov 16   ;;  %s1585_s27 = smov 15   ;;  %s2535_s0 = inlined_call_operand.vmem [shape: f32[16,512], index: 0, kind: input, shape index: {}]   ;;  %s2536_s1 = inlined_call_operand.vmem [shape: f32[16,16], index: 1, kind: input, shape index: {}]   ;;  %s2537_s5 = inlined_call_operand.vmem [shape: f32[16,1], index: 5, kind: input, shape index: {}]   ;;  %s2538_s6 = inlined_call_operand.vmem [shape: f32[16,1], index: 6, kind: input, shape index: {}]   ;;  %s2539_s3 = inlined_call_operand.vmem [shape: f32[9,512], index: 3, kind: input, shape index: {}]   ;;  %s2540_s2 = inlined_call_operand.vmem [shape: f32[16,144], index: 2, kind: input, shape index: {}]   ;;  %s2541_s7 = inlined_call_operand.vmem [shape: f32[16,1], index: 7, kind: input, shape index: {}]   ;;  %s2542_s8 = inlined_call_operand.vmem [shape: f32[16,1], index: 8, kind: input, shape index: {}]   ;;  %s2543_s4 = inlined_call_operand.vmem [shape: f32[16,16], index: 4, kind: input, shape index: {}]   ;;  %s2544_s9 = inlined_call_operand.vmem [shape: f32[16,1], index: 9, kind: input, shape index: {}]   ;;  %s2545_s10 = inlined_call_operand.vmem [shape: f32[16,1], index: 10, kind: input, shape index: {}]   ;;  %s2546_s11 = inlined_call_operand.vmem [shape: f32[16,512], index: 11, kind: output, shape index: {}]  }
   0x1   :  { %v39_v0 = vld [vmem:[%s2535_s0 + $0x8] sm:$0xff]  ;;  %v38_v2 = vld [vmem:[%s2535_s0] sm:$0xff]  ;;  %119 = vmatprep.mubr.f32.mxu0 %v2547_v3  ;;  %196 = vmatprep.mubr.f32.mxu1 %v2547_v3  ;;  %v41_v6 = vld [vmem:[%s2535_s0 + $0x18] sm:$0xff]  ;;  %s1586_s28 = smov 1   ;;  %s1587_s29 = smov 127  }
   0x2   :  { %v43_v1 = vld [vmem:[%s2535_s0 + $0x28] sm:$0xff]  ;;  %v42_v5 = vld [vmem:[%s2535_s0 + $0x20] sm:$0xff]  ;;  %v45_v7 = vld [vmem:[%s2535_s0 + $0x38] sm:$0xff]  ;;  %1559 = vset.pattern.permute.xlu0 %v1582_v55  ;;  %1560 = vset.pattern.permute.xlu1 %v1582_v55  ;;  %s1588_s30 = smov 113   ;;  %s1589_s12 = smov 112  }
   0x3   :  { %v1461_v4 = vpack.c.bf16 %v43_v1, %v39_v0  ;;  %v1463_v8 = vpack.c.bf16 %v42_v5, %v38_v2  ;;  %v1465_v9 = vpack.c.bf16 %v45_v7, %v41_v6  ;;  %v40_v10 = vld [vmem:[%s2535_s0 + $0x10] sm:$0xff]  ;;  %v46_v13 = vld [vmem:[%s2536_s1] sm:$0xff]  ;;  %v47_v14 = vld [vmem:[%s2536_s1 + $0x8] sm:$0xff]  ;;  %s1590_s13 = smov 111  }
   0x4   :  { %v44_v11 = vld [vmem:[%s2535_s0 + $0x30] sm:$0xff]  ;;  %v209_v62 = vld [vmem:[%s2537_s5] sm:$0xff]  ;;  %v210_v1 = vld [vmem:[%s2537_s5 + $0x8] sm:$0xff] }
   0x5   :  { %1462 = vmatprep.subr.bf16.mxu0 %v1461_v4  ;;  %v1467_v12 = vpack.c.bf16 %v44_v11, %v40_v10  ;;  %1466 = vmatprep.subr.bf16.mxu1 %v1465_v9  ;;  %v211_v6 = vld [vmem:[%s2538_s6] sm:$0xff]  ;;  %v212_v9 = vld [vmem:[%s2538_s6 + $0x8] sm:$0xff]  ;;  %v323_v11 = vlaneseq  ;;  %s1583_s6 = smov 17  }
   0x6   :  { %1464 = vmatpush1.bf16.msra.mxu0 %v1463_v8 }
   0x7   :  { %1468 = vmatpush1.bf16.msra.mxu1 %v1467_v12  ;;  %v1734_v12 = vshrl.u32 %v323_v11, 7 }
   0x9   :  { %1442 = vmatmul.mubr.msk.f32.vlgmr.msra.gmra.mrb[0].mxu0 %vm48_vm0, %v46_v13 }
   0xa   :  { %1444 = vmatmul.mubr.msk.f32.vlgmr.msra.gmra.mrb[0].mxu1 %vm48_vm0, %v46_v13  ;;  %125 = vmatprep.mubr.f32.mxu0 %v2547_v3  ;;  %v1739_v13 = vld [vmem:[%s2539_s3] ss:$8 sm:$0xf] }
   0xb   :  { %202 = vmatprep.mubr.f32.mxu1 %v2547_v3 }
   0xd   :  { %1443 = vmatmul.mubr.msk.f32.gmra.mrb[2].mxu0 %vm48_vm0, %v47_v14 }
   0xe   :  { %1445 = vmatmul.mubr.msk.f32.gmra.mrb[2].mxu1 %vm48_vm0, %v47_v14  ;;  %v1742_v14 = vsub.s32 1, %v1734_v12 }
  0xdc   :  { %v1689_v15 = vpop.f32.mrb[0].mxu0 }
  0xdd   :  { %v1691_v16 = vpop.f32.mrb[1].mxu0  ;;  %v1693_v17 = vpop.f32.mrb[0].mxu1 }
  0xde   :  { %v213_v18 = vadd.f32 %v1691_v16, %v1689_v15  ;;  %v1697_v19 = vpop.f32.mrb[1].mxu1 }
  0xe0   :  { %v1699_v20 = vpop.f32.mrb[2].mxu0  ;;  %v214_v21 = vadd.f32 %v213_v18, %v1693_v17 }
  0xe1   :  { %v1702_v22 = vpop.f32.mrb[3].mxu0  ;;  %v1704_v23 = vpop.f32.mrb[2].mxu1 }
  0xe2   :  { %v218_v24 = vadd.f32 %v1702_v22, %v1699_v20  ;;  %v1708_v25 = vpop.f32.mrb[3].mxu1  ;;  %v215_v26 = vadd.f32 %v214_v21, %v1697_v19 }
  0xe4   :  { %216 = vadd.xlane.f32.xlu0 %v215_v26  ;;  %v219_v27 = vadd.f32 %v218_v24, %v1704_v23  ;;  %v1746_v24 = vrot.slane %v1739_v13, %v1742_v14  ;;  %v1749_v26 = vsub.s32 0, %v1734_v12 }
  0xe6   :  { %v220_v28 = vadd.f32 %v219_v27, %v1708_v25 }
  0xe8   :  { %221 = vadd.xlane.f32.xlu0 %v220_v28 }
 0x171   :  { %v217_v29 = vpop.xlane.xlu0 %216 }
 0x172   :  { %v223_v30 = vmul.f32 0.001953125, %v217_v29  ;;  %v1754_v29 = vrot.slane %v1739_v13, %v1749_v26 }
 0x174   :  { %v225_v31 = vsub.f32 %v1689_v15, %v223_v30  ;;  %v226_v32 = vsub.f32 %v1691_v16, %v223_v30  ;;  %v227_v33 = vsub.f32 %v1693_v17, %v223_v30  ;;  %v228_v35 = vsub.f32 %v1697_v19, %v223_v30 }
 0x175   :  { %v222_v34 = vpop.xlane.xlu0 %221 }
 0x176   :  { %v224_v36 = vmul.f32 0.001953125, %v222_v34  ;;  %v233_v37 = vmul.f32 %v225_v31, %v225_v31  ;;  %v234_v38 = vmul.f32 %v226_v32, %v226_v32  ;;  %v235_v39 = vmul.f32 %v227_v33, %v227_v33 }
 0x177   :  { %v236_v44 = vmul.f32 %v228_v35, %v228_v35  ;;  %v1758_v32 = vsub.s32 2, %v1734_v12 }
 0x178   :  { %v241_v40 = vadd.f32 %v234_v38, %v233_v37  ;;  %v229_v41 = vsub.f32 %v1699_v20, %v224_v36  ;;  %v230_v42 = vsub.f32 %v1702_v22, %v224_v36  ;;  %v231_v43 = vsub.f32 %v1704_v23, %v224_v36 }
 0x179   :  { %v232_v46 = vsub.f32 %v1708_v25, %v224_v36 }
 0x17a   :  { %v242_v45 = vadd.f32 %v241_v40, %v235_v39  ;;  %v237_v47 = vmul.f32 %v229_v41, %v229_v41  ;;  %v238_v48 = vmul.f32 %v230_v42, %v230_v42  ;;  %v239_v50 = vmul.f32 %v231_v43, %v231_v43 }
 0x17b   :  { %v240_v52 = vmul.f32 %v232_v46, %v232_v46 }
 0x17c   :  { %v243_v49 = vadd.f32 %v242_v45, %v236_v44  ;;  %v246_v51 = vadd.f32 %v238_v48, %v237_v47 }
 0x17e   :  { %244 = vadd.xlane.f32.xlu1 %v243_v49  ;;  %v247_v53 = vadd.f32 %v246_v51, %v239_v50 }
 0x180   :  { %v248_v54 = vadd.f32 %v247_v53, %v240_v52 }
 0x182   :  { %249 = vadd.xlane.f32.xlu1 %v248_v54  ;;  %v1872_v54 = vsub.s32 3, %v1734_v12 }
 0x20b   :  { %v245_v56 = vpop.xlane.xlu1 %244 }
 0x20c   :  { %v251_v57 = vmul.f32 0.001953125, %v245_v56 }
 0x20e   :  { %v253_v58 = vadd.f32 1e-05, %v251_v57 }
 0x20f   :  { %v250_v59 = vpop.xlane.xlu1 %249 }
 0x210   :  { %1561 = vrsqrt.f32 %v253_v58  ;;  %v252_v60 = vmul.f32 0.001953125, %v250_v59  ;;  %v829_v58 = vld [vmem:[%s2540_s2 + $0x8] sm:$0xff] }
 0x211   :  { %1453 = vmatprep.mubr.msk.f32.mxu0 %vm48_vm0, %v829_v58  ;;  %1455 = vmatprep.mubr.msk.f32.mxu1 %vm48_vm0, %v829_v58 }
 0x212   :  { %v254_v61 = vadd.f32 1e-05, %v252_v60  ;;  %v351_v60 = vrot.slane %v1739_v13, %v1872_v54 }
 0x214   :  { %1563 = vrsqrt.f32 %v254_v61 }
 0x21a   :  { %v1562_v63 = vpop.eup %1561 }
 0x21b   :  { %v257_v0 = vmul.f32 %v1562_v63, %v209_v62  ;;  %v1446_v62 = vld [vmem:[%s2539_s3 + $0x1] ss:$8 sm:$0xf] }
 0x21d   :  { %265 = vperm.xlu0 %1559, %v257_v0   ;;  %v259_v5 = vmul.f32 %v257_v0, %v223_v30 }
 0x21e   :  { %v1564_v2 = vpop.eup %1563 }
 0x21f   :  { %v258_v4 = vmul.f32 %v1564_v2, %v210_v1  ;;  %v261_v7 = vsub.f32 %v211_v6, %v259_v5 }
 0x221   :  { %270 = vperm.xlu1 %1560, %v258_v4   ;;  %v260_v8 = vmul.f32 %v258_v4, %v224_v36 }
 0x223   :  { %v262_v10 = vsub.f32 %v212_v9, %v260_v8 }
 0x225   :  { %283 = vperm.xlu1 %1560, %v261_v7   ;;  %v407_v7 = vrot.slane %v1446_v62, %v1742_v14 }
 0x229   :  { %288 = vperm.xlu1 %1560, %v262_v10  }
 0x29c   :  { %v266_v18 = vpop.permute.xlu0 %265 }
 0x29d   :  { %v273_v27 = vmul.f32 %v266_v18, %v1689_v15  ;;  %v274_v30 = vmul.f32 %v266_v18, %v1691_v16  ;;  %v1765_v15 = vrot.slane %v1739_v13, %v1758_v32  ;;  %v276_v37 = vmul.f32 %v266_v18, %v1697_v19 }
 0x29e   :  { %v275_v42 = vmul.f32 %v266_v18, %v1693_v17  ;;  %v403_v13 = vrot.slane %v1446_v62, %v1749_v26 }
 0x2a0   :  { %v271_v21 = vpop.permute.xlu1 %270 }
 0x2a1   :  { %v280_v33 = vmul.f32 %v271_v21, %v1708_v25  ;;  %v279_v38 = vmul.f32 %v271_v21, %v1704_v23  ;;  %v277_v43 = vmul.f32 %v271_v21, %v1699_v20  ;;  %v278_v46 = vmul.f32 %v271_v21, %v1702_v22 }
 0x2a2   :  { %v1854_v22 = vand.u32 127, %v323_v11 }
 0x2a4   :  { %v284_v28 = vpop.permute.xlu1 %283  ;;  %vm325_vm1 = vcmp.lt.s32.totalorder %v1854_v22, 17  ;;  %vm388_vm2 = vcmp.lt.s32.totalorder %v1854_v22, 16  ;;  %vm452_vm3 = vcmp.lt.s32.totalorder %v1854_v22, 15  ;;  %vm516_vm4 = vcmp.lt.s32.totalorder %v1854_v22, 1 }
 0x2a5   :  { %v291_v31 = vadd.f32 %v284_v28, %v273_v27  ;;  %v292_v34 = vadd.f32 %v284_v28, %v274_v30  ;;  %v294_v16 = vadd.f32 %v284_v28, %v276_v37  ;;  %v293_v19 = vadd.f32 %v284_v28, %v275_v42 }
 0x2a6   :  { %vm588_vm5 = vcmp.lt.s32.totalorder %v1854_v22, 127  ;;  %vm652_vm6 = vcmp.lt.s32.totalorder %v1854_v22, 113  ;;  %vm716_vm7 = vcmp.lt.s32.totalorder %v1854_v22, 112  ;;  %vm780_vm8 = vcmp.lt.s32.totalorder %v1854_v22, 111  ;;  %v830_v22 = vld [vmem:[%s2540_s2 + $0x10] sm:$0xff] }
 0x2a7   :  { %v1761_v35 = vmax.f32 %v291_v31, 0.0  ;;  %v1771_v40 = vmax.f32 %v292_v34, 0.0  ;;  %v1781_v23 = vmax.f32 %v294_v16, 0.0  ;;  %v1790_v17 = vmax.f32 %v293_v19, 0.0 }
 0x2a8   :  { %v289_v36 = vpop.permute.xlu1 %288 }
 0x2a9   :  { %2562 = vst [vmem:[#allocation3_spill] sm:$0xff] %v1761_v35  ;;  %v298_v39 = vadd.f32 %v289_v36, %v280_v33  ;;  %307 = vrot.lane.b32.xlu1 %v1761_v35, %s1583_s6  ;;  %v297_v25 = vadd.f32 %v289_v36, %v279_v38  ;;  %v295_v44 = vadd.f32 %v289_v36, %v277_v43 }
 0x2aa   :  { %v296_v20 = vadd.f32 %v289_v36, %v278_v46  ;;  %v411_v33 = vrot.slane %v1446_v62, %v1758_v32 }
 0x2ab   :  { %v1773_v41 = vmax.f32 %v298_v39, 0.0  ;;  %v1783_v45 = vmax.f32 %v297_v25, 0.0  ;;  %v1792_v47 = vmax.f32 %v295_v44, 0.0  ;;  %v415_v25 = vrot.slane %v1446_v62, %v1872_v54 }
 0x2ac   :  { %v1797_v48 = vmax.f32 %v296_v20, 0.0 }
 0x2ad   :  { %321 = vrot.lane.b32.xlu0 %v1773_v41, %s1583_s6  ;;  %311 = vrot.lane.b32.xlu1 %v1771_v40, %s1583_s6  ;;  %2563 = vst [vmem:[#allocation4_spill] sm:$0xff] %v1792_v47 }
 0x2b1   :  { %317 = vrot.lane.b32.xlu0 %v1783_v45, %s1583_s6  ;;  %319 = vrot.lane.b32.xlu1 %v1781_v23, %s1583_s6 }
 0x2b5   :  { %374 = vrot.lane.b32.xlu0 %v1792_v47, %s1584_s26  ;;  %315 = vrot.lane.b32.xlu1 %v1790_v17, %s1583_s6 }
 0x2b9   :  { %378 = vrot.lane.b32.xlu0 %v1797_v48, %s1584_s26  ;;  %372 = vrot.lane.b32.xlu1 %v1761_v35, %s1584_s26 }
 0x2bd   :  { %386 = vrot.lane.b32.xlu0 %v1773_v41, %s1584_s26  ;;  %376 = vrot.lane.b32.xlu1 %v1771_v40, %s1584_s26 }
 0x2c1   :  { %382 = vrot.lane.b32.xlu0 %v1783_v45, %s1584_s26  ;;  %384 = vrot.lane.b32.xlu1 %v1781_v23, %s1584_s26 }
 0x2c5   :  { %438 = vrot.lane.b32.xlu0 %v1792_v47, %s1585_s27  ;;  %380 = vrot.lane.b32.xlu1 %v1790_v17, %s1584_s26 }
 0x2c9   :  { %442 = vrot.lane.b32.xlu0 %v1797_v48, %s1585_s27  ;;  %436 = vrot.lane.b32.xlu1 %v1761_v35, %s1585_s27 }
 0x2cd   :  { %450 = vrot.lane.b32.xlu0 %v1773_v41, %s1585_s27  ;;  %440 = vrot.lane.b32.xlu1 %v1771_v40, %s1585_s27 }
 0x2d1   :  { %446 = vrot.lane.b32.xlu0 %v1783_v45, %s1585_s27  ;;  %448 = vrot.lane.b32.xlu1 %v1781_v23, %s1585_s27 }
 0x2d5   :  { %502 = vrot.lane.b32.xlu0 %v1792_v47, %s1586_s28  ;;  %444 = vrot.lane.b32.xlu1 %v1790_v17, %s1585_s27 }
 0x2d9   :  { %506 = vrot.lane.b32.xlu0 %v1797_v48, %s1586_s28  ;;  %500 = vrot.lane.b32.xlu1 %v1761_v35, %s1586_s28 }
 0x2dd   :  { %514 = vrot.lane.b32.xlu0 %v1773_v41, %s1586_s28  ;;  %504 = vrot.lane.b32.xlu1 %v1771_v40, %s1586_s28 }
 0x2e1   :  { %510 = vrot.lane.b32.xlu0 %v1783_v45, %s1586_s28  ;;  %512 = vrot.lane.b32.xlu1 %v1781_v23, %s1586_s28 }
 0x2e5   :  { %578 = vrot.lane.b32.xlu0 %v1797_v48, %s1587_s29  ;;  %508 = vrot.lane.b32.xlu1 %v1790_v17, %s1586_s28 }
 0x2e9   :  { %582 = vrot.lane.b32.xlu0 %v1783_v45, %s1587_s29  ;;  %576 = vrot.lane.b32.xlu1 %v1771_v40, %s1587_s29 }
 0x2ed   :  { %574 = vrot.lane.b32.xlu0 %v1792_v47, %s1587_s29  ;;  %580 = vrot.lane.b32.xlu1 %v1790_v17, %s1587_s29 }
 0x2f1   :  { %586 = vrot.lane.b32.xlu0 %v1773_v41, %s1587_s29  ;;  %572 = vrot.lane.b32.xlu1 %v1761_v35, %s1587_s29 }
 0x2f5   :  { %642 = vrot.lane.b32.xlu0 %v1797_v48, %s1588_s30  ;;  %584 = vrot.lane.b32.xlu1 %v1781_v23, %s1587_s29 }
 0x2f9   :  { %646 = vrot.lane.b32.xlu0 %v1783_v45, %s1588_s30  ;;  %640 = vrot.lane.b32.xlu1 %v1771_v40, %s1588_s30 }
 0x2fd   :  { %638 = vrot.lane.b32.xlu0 %v1792_v47, %s1588_s30  ;;  %644 = vrot.lane.b32.xlu1 %v1790_v17, %s1588_s30 }
 0x301   :  { %650 = vrot.lane.b32.xlu0 %v1773_v41, %s1588_s30  ;;  %636 = vrot.lane.b32.xlu1 %v1761_v35, %s1588_s30 }
 0x305   :  { %706 = vrot.lane.b32.xlu0 %v1797_v48, %s1589_s12  ;;  %309 = vrot.lane.b32.xlu1 %v1792_v47, %s1583_s6 }
 0x309   :  { %710 = vrot.lane.b32.xlu0 %v1783_v45, %s1589_s12  ;;  %313 = vrot.lane.b32.xlu1 %v1797_v48, %s1583_s6 }
 0x30d   :  { %702 = vrot.lane.b32.xlu0 %v1792_v47, %s1589_s12  ;;  %648 = vrot.lane.b32.xlu1 %v1781_v23, %s1588_s30 }
 0x311   :  { %714 = vrot.lane.b32.xlu0 %v1773_v41, %s1589_s12  ;;  %704 = vrot.lane.b32.xlu1 %v1771_v40, %s1589_s12 }
 0x315   :  { %770 = vrot.lane.b32.xlu0 %v1797_v48, %s1590_s13  ;;  %708 = vrot.lane.b32.xlu1 %v1790_v17, %s1589_s12 }
 0x319   :  { %774 = vrot.lane.b32.xlu0 %v1783_v45, %s1590_s13  ;;  %700 = vrot.lane.b32.xlu1 %v1761_v35, %s1589_s12 }
 0x31b   :  { %v308_v49 = vpop.permute.xlu1 %307 }
 0x31d   :  { %766 = vrot.lane.b32.xlu0 %v1792_v47, %s1590_s13  ;;  %712 = vrot.lane.b32.xlu1 %v1781_v23, %s1589_s12 }
 0x31f   :  { %v312_v50 = vpop.permute.xlu1 %311  ;;  %v1860_v51 = vpop.permute.xlu0 %321 }
 0x320   :  { %v330_v52 = vsel %vm325_vm1, %v308_v49, %v312_v50 }
 0x321   :  { %v1865_v53 = vmul.f32 %v1746_v24, %v330_v52  ;;  %778 = vrot.lane.b32.xlu0 %v1773_v41, %s1590_s13  ;;  %768 = vrot.lane.b32.xlu1 %v1771_v40, %s1590_s13 }
 0x323   :  { %v320_v55 = vpop.permute.xlu1 %319  ;;  %v1874_v56 = vpop.permute.xlu0 %317 }
 0x324   :  { %v332_v57 = vsel %vm325_vm1, %v320_v55, %v308_v49  ;;  %v327_v61 = vsel %vm325_vm1, %v1874_v56, %v1860_v51 }
 0x325   :  { %v1882_v59 = vmul.f32 %v1754_v29, %v332_v57  ;;  %772 = vrot.lane.b32.xlu1 %v1790_v17, %s1590_s13  ;;  %v363_v4 = vmul.f32 %v351_v60, %v327_v61  ;;  %v1952_v57 = vld [vmem:[%s2539_s3 + $0x2] ss:$8 sm:$0xf] }
 0x327   :  { %v316_v63 = vpop.permute.xlu1 %315  ;;  %v375_v0 = vpop.permute.xlu0 %374 }
 0x328   :  { %v326_v1 = vsel %vm325_vm1, %v316_v63, %v320_v55  ;;  %v328_v2 = vsel %vm325_vm1, %v312_v50, %v316_v63  ;;  %v471_v63 = vrot.slane %v1952_v57, %v1742_v14 }
 0x329   :  { %v1903_v5 = vmul.f32 %v1765_v15, %v328_v2  ;;  %v359_v6 = vmul.f32 %v351_v60, %v326_v1  ;;  %764 = vrot.lane.b32.xlu1 %v1761_v35, %s1590_s13 }
 0x32b   :  { %v373_v8 = vpop.permute.xlu1 %372  ;;  %v379_v9 = vpop.permute.xlu0 %378  ;;  %v1505_v10 = vpack.c.bf16 %v363_v4, %v359_v6 }
 0x32c   :  { %v394_v11 = vsel %vm388_vm2, %v375_v0, %v379_v9 }
 0x32d   :  { %v1910_v12 = vmul.f32 %v407_v7, %v394_v11  ;;  %776 = vrot.lane.b32.xlu1 %v1781_v23, %s1590_s13  ;;  %1506 = vmatprep.subr.bf16.mxu1 %v1505_v10 }
 0x32f   :  { %v377_v18 = vpop.permute.xlu1 %376  ;;  %v387_v21 = vpop.permute.xlu0 %386 }
 0x330   :  { %v393_v27 = vsel %vm388_vm2, %v373_v8, %v377_v18  ;;  %v396_v28 = vsel %vm388_vm2, %v387_v21, %v375_v0  ;;  %v467_v0 = vrot.slane %v1952_v57, %v1749_v26 }
 0x331   :  { %v1919_v30 = vmul.f32 %v407_v7, %v393_v27  ;;  %v1921_v31 = vmul.f32 %v403_v13, %v396_v28  ;;  %v475_v28 = vrot.slane %v1952_v57, %v1758_v32 }
 0x333   :  { %v385_v34 = vpop.permute.xlu1 %384  ;;  %v383_v36 = vpop.permute.xlu0 %382 }
 0x334   :  { %v395_v38 = vsel %vm388_vm2, %v385_v34, %v373_v8  ;;  %v392_v39 = vsel %vm388_vm2, %v379_v9, %v383_v36  ;;  %v390_v43 = vsel %vm388_vm2, %v383_v36, %v387_v21 }
 0x335   :  { %v1930_v16 = vmul.f32 %v403_v13, %v395_v38  ;;  %v1933_v42 = vmul.f32 %v411_v33, %v392_v39  ;;  %v1943_v50 = vmul.f32 %v415_v25, %v390_v43 }
 0x337   :  { %v381_v44 = vpop.permute.xlu1 %380  ;;  %v439_v46 = vpop.permute.xlu0 %438 }
 0x338   :  { %v389_v20 = vsel %vm388_vm2, %v381_v44, %v385_v34  ;;  %v391_v49 = vsel %vm388_vm2, %v377_v18, %v381_v44 }
 0x339   :  { %v1945_v52 = vmul.f32 %v411_v33, %v391_v49  ;;  %v1947_v55 = vmul.f32 %v415_v25, %v389_v20 }
 0x33b   :  { %v437_v60 = vpop.permute.xlu1 %436  ;;  %v443_v61 = vpop.permute.xlu0 %442 }
 0x33c   :  { %v458_v1 = vsel %vm452_vm3, %v439_v46, %v443_v61 }
 0x33d   :  { %v1969_v8 = vmul.f32 %v471_v63, %v458_v1 }
 0x33f   :  { %v441_v2 = vpop.permute.xlu1 %440  ;;  %v451_v4 = vpop.permute.xlu0 %450 }
 0x340   :  { %v457_v6 = vsel %vm452_vm3, %v437_v60, %v441_v2  ;;  %v460_v7 = vsel %vm452_vm3, %v451_v4, %v439_v46 }
 0x341   :  { %v1971_v9 = vmul.f32 %v471_v63, %v457_v6  ;;  %v1973_v10 = vmul.f32 %v467_v0, %v460_v7 }
 0x343   :  { %2564 = vst [vmem:[#allocation5_spill] sm:$0xff] %v1973_v10  ;;  %v449_v11 = vpop.permute.xlu1 %448  ;;  %v447_v13 = vpop.permute.xlu0 %446 }
 0x344   :  { %v459_v21 = vsel %vm452_vm3, %v449_v11, %v437_v60  ;;  %v456_v33 = vsel %vm452_vm3, %v443_v61, %v447_v13 }
 0x345   :  { %v1979_v27 = vmul.f32 %v467_v0, %v459_v21  ;;  %v1991_v25 = vmul.f32 %v475_v28, %v456_v33 }
 0x347   :  { %2565 = vst [vmem:[#allocation6_spill] sm:$0xff] %v1979_v27  ;;  %v445_v36 = vpop.permute.xlu1 %444  ;;  %v1987_v38 = vpop.permute.xlu0 %502 }
 0x348   :  { %v455_v39 = vsel %vm452_vm3, %v441_v2, %v445_v36 }
 0x349   :  { %v1993_v43 = vmul.f32 %v475_v28, %v455_v39 }
 0x34b   :  { %v1997_v46 = vpop.permute.xlu1 %500  ;;  %v1999_v20 = vpop.permute.xlu0 %506 }
 0x34f   :  { %v2001_v49 = vpop.permute.xlu1 %504  ;;  %v2003_v60 = vpop.permute.xlu0 %514 }
 0x353   :  { %v2005_v61 = vpop.permute.xlu1 %512  ;;  %v2007_v63 = vpop.permute.xlu0 %510 }
 0x357   :  { %v2009_v0 = vpop.permute.xlu1 %508  ;;  %v2011_v1 = vpop.permute.xlu0 %578 }
 0x35b   :  { %v2013_v2 = vpop.permute.xlu1 %576  ;;  %v2015_v6 = vpop.permute.xlu0 %582 }
 0x35f   :  { %v2017_v7 = vpop.permute.xlu1 %580  ;;  %v2019_v21 = vpop.permute.xlu0 %574 }
 0x363   :  { %v2021_v28 = vpop.permute.xlu1 %572  ;;  %v2023_v33 = vpop.permute.xlu0 %586 }
 0x367   :  { %v2025_v39 = vpop.permute.xlu1 %584  ;;  %v2027_v3 = vpop.permute.xlu0 %642 }
 0x368   :  { %2566 = vst [vmem:[#allocation7_spill] sm:$0xff] %v2027_v3 }
 0x36b   :  { %v2029_v34 = vpop.permute.xlu1 %640  ;;  %v2031_v44 = vpop.permute.xlu0 %646 }
 0x36c   :  { %2567 = vst [vmem:[#allocation8_spill] sm:$0xff] %v2029_v34  ;;  %2568 = vst [vmem:[#allocation9_spill] sm:$0xff] %v2031_v44  ;;  %v1448_v44 = vld [vmem:[%s2539_s3 + $0x3] ss:$8 sm:$0xf] }
 0x36f   :  { %v2033_v18 = vpop.permute.xlu1 %644  ;;  %v2035_v19 = vpop.permute.xlu0 %638 }
 0x370   :  { %2569 = vst [vmem:[#allocation10_spill] sm:$0xff] %v2033_v18  ;;  %2570 = vst [vmem:[#allocation11_spill] sm:$0xff] %v2035_v19 }
 0x373   :  { %v2037_v58 = vpop.permute.xlu1 %636  ;;  %v2039_v37 = vpop.permute.xlu0 %650 }
 0x374   :  { %2571 = vst [vmem:[#allocation12_spill] sm:$0xff] %v2039_v37 }
 0x377   :  { %v310_v62 = vpop.permute.xlu1 %309  ;;  %v2041_v27 = vpop.permute.xlu0 %706 }
 0x378   :  { %2572 = vst [vmem:[#allocation13_spill] sm:$0xff] %v2041_v27  ;;  %v333_v10 = vsel %vm325_vm1, %v1860_v51, %v310_v62  ;;  %v453_v51 = vsel %vm452_vm3, %v445_v36, %v449_v11  ;;  %v1449_v27 = vld [vmem:[%s2539_s3 + $0x5] ss:$8 sm:$0xf] }
 0x379   :  { %v360_v3 = vmul.f32 %v1754_v29, %v333_v10 }
 0x37b   :  { %v1471_v34 = vpack.c.bf16 %v360_v3, %v1882_v59  ;;  %v314_v19 = vpop.permute.xlu1 %313  ;;  %v2051_v18 = vpop.permute.xlu0 %710  ;;  %v479_v59 = vrot.slane %v1952_v57, %v1872_v54  ;;  %v531_v57 = vrot.slane %v1448_v44, %v1749_v26  ;;  %v539_v3 = vrot.slane %v1448_v44, %v1758_v32 }
 0x37c   :  { %2573 = vst [vmem:[#allocation14_spill] sm:$0xff] %v2051_v18  ;;  %v329_v29 = vsel %vm325_vm1, %v314_v19, %v1874_v56  ;;  %v331_v10 = vsel %vm325_vm1, %v310_v62, %v314_v19  ;;  %v454_v19 = vsel %vm452_vm3, %v447_v13, %v451_v4  ;;  %v535_v62 = vrot.slane %v1448_v44, %v1742_v14 }
 0x37d   :  { %v361_v37 = vmul.f32 %v1746_v24, %v331_v10  ;;  %v362_v11 = vmul.f32 %v1765_v15, %v329_v29  ;;  %v487_v36 = vmul.f32 %v479_v59, %v453_v51  ;;  %v1450_v24 = vld [vmem:[%s2539_s3 + $0x6] ss:$8 sm:$0xf]  ;;  %v543_v13 = vrot.slane %v1448_v44, %v1872_v54 }
 0x37e   :  { %v2092_v56 = vrot.slane %v1449_v27, %v1742_v14  ;;  %v2095_v51 = vrot.slane %v1449_v27, %v1749_v26  ;;  %v2098_v18 = vrot.slane %v1449_v27, %v1758_v32  ;;  %v491_v35 = vmul.f32 %v479_v59, %v454_v19  ;;  %v1451_v59 = vld [vmem:[%s2539_s3 + $0x7] ss:$8 sm:$0xf] }
 0x37f   :  { %v1507_v15 = vpack.c.bf16 %v362_v11, %v1903_v5  ;;  %v2085_v29 = vpop.permute.xlu1 %648  ;;  %v2087_v10 = vpop.permute.xlu0 %702  ;;  %v1469_v4 = vpack.c.bf16 %v361_v37, %v1865_v53  ;;  %v517_v5 = vsel %vm516_vm4, %v2009_v0, %v2005_v61  ;;  %v2105_v11 = vrot.slane %v1449_v27, %v1872_v54 }
 0x380   :  { %2574 = vst [vmem:[#allocation15_spill] sm:$0xff] %v2087_v10  ;;  %v521_v53 = vsel %vm516_vm4, %v1997_v46, %v2001_v49  ;;  %v2112_v37 = vrot.slane %v1450_v24, %v1742_v14  ;;  %v2115_v44 = vrot.slane %v1450_v24, %v1749_v26  ;;  %v2575_v27 = vpack.c.bf16 %v1943_v50, %v1947_v55 }
 0x381   :  { %1470 = vmatprep.subr.bf16.mxu0 %v1469_v4  ;;  %1508 = vmatpush1.bf16.msra.mxu1 %v1507_v15  ;;  %v518_v19 = vsel %vm516_vm4, %v2007_v63, %v2003_v60  ;;  %v2128_v15 = vrot.slane %v1450_v24, %v1758_v32  ;;  %v2131_v4 = vrot.slane %v1450_v24, %v1872_v54 }
 0x382   :  { %1472 = vmatpush1.bf16.msra.mxu0 %v1471_v34  ;;  %1510 = vmatprep.subr.bf16.mxu1 %v2575_v27  ;;  %v2576_v34 = vpack.c.bf16 %v1910_v12, %v1919_v30  ;;  %v1513_v50 = vpack.c.bf16 %v491_v35, %v487_v36  ;;  %v522_v55 = vsel %vm516_vm4, %v1987_v38, %v1999_v20 }
 0x383   :  { %v2133_v10 = vpop.permute.xlu1 %704  ;;  %v2138_v47 = vpop.permute.xlu0 %714  ;;  %v524_v24 = vsel %vm516_vm4, %v2003_v60, %v1987_v38  ;;  %v519_v27 = vsel %vm516_vm4, %v2001_v49, %v2009_v0  ;;  %v551_v12 = vmul.f32 %v543_v13, %v517_v5  ;;  %v549_v30 = vmul.f32 %v535_v62, %v521_v53 }
 0x384   :  { %1474 = vmatprep.subr.bf16.mxu0 %v2576_v34  ;;  %v523_v35 = vsel %vm516_vm4, %v2005_v61, %v1997_v46  ;;  %v2157_v36 = vrot.slane %v1451_v59, %v1742_v14  ;;  %v2160_v34 = vrot.slane %v1451_v59, %v1749_v26  ;;  %v2577_v38 = vpack.c.bf16 %v1933_v42, %v1945_v52 }
 0x385   :  { %v520_v49 = vsel %vm516_vm4, %v1999_v20, %v2007_v63  ;;  %v555_v60 = vmul.f32 %v543_v13, %v518_v19  ;;  %v2171_v46 = vrot.slane %v1451_v59, %v1758_v32  ;;  %v2578_v61 = vpack.c.bf16 %v1921_v31, %v1930_v16 }
 0x386   :  { %1512 = vmatpush1.bf16.msra.mxu1 %v2577_v38  ;;  %v553_v0 = vmul.f32 %v535_v62, %v522_v55  ;;  %v552_v5 = vmul.f32 %v531_v57, %v524_v24  ;;  %v550_v42 = vmul.f32 %v539_v3, %v519_v27  ;;  %v591_v52 = vsel %vm588_vm5, %v2013_v2, %v2017_v7 }
 0x387   :  { %1476 = vmatpush1.bf16.msra.mxu0 %v2578_v61  ;;  %1514 = vmatprep.subr.bf16.mxu1 %v1513_v50  ;;  %v2180_v20 = vpop.permute.xlu1 %708  ;;  %v2579_v63 = vpack.c.bf16 %v1969_v8, %v1971_v9  ;;  %v548_v13 = vmul.f32 %v531_v57, %v523_v35  ;;  %v593_v31 = vsel %vm588_vm5, %v2021_v28, %v2013_v2  ;;  %v2201_v9 = vpop.permute.xlu0 %770 }
 0x388   :  { %v595_v16 = vsel %vm588_vm5, %v2025_v39, %v2021_v28  ;;  %v1517_v62 = vpack.c.bf16 %v555_v60, %v551_v12  ;;  %v554_v53 = vmul.f32 %v539_v3, %v520_v49  ;;  %v592_v19 = vsel %vm588_vm5, %v2011_v1, %v2015_v6  ;;  %v2209_v28 = vld [vmem:[%s2539_s3 + $0x20] ss:$8 sm:$0xf] }
 0x389   :  { %1478 = vmatprep.subr.bf16.mxu0 %v2579_v63  ;;  %v594_v8 = vsel %vm588_vm5, %v2019_v21, %v2011_v1  ;;  %v2580_v2 = vpack.c.bf16 %v1991_v25, %v1993_v43  ;;  %v1481_v57 = vpack.c.bf16 %v553_v0, %v549_v30  ;;  %v621_v3 = vmul.f32 %v2092_v56, %v591_v52  ;;  %v2581_v25 = vld [vmem:[#allocation5_spill] sm:$0xff]  ;;  %v2582_v43 = vld [vmem:[#allocation6_spill] sm:$0xff] }
 0x38a   :  { %v596_v50 = vsel %vm588_vm5, %v2023_v33, %v2019_v21  ;;  %v589_v1 = vsel %vm588_vm5, %v2017_v7, %v2025_v39  ;;  %v2583_v55 = vpack.c.bf16 %v2581_v25, %v2582_v43  ;;  %v1519_v24 = vpack.c.bf16 %v554_v53, %v550_v42  ;;  %v2588_v42 = vld [vmem:[#allocation12_spill] sm:$0xff]  ;;  %v2594_v25 = vld [vmem:[#allocation3_spill] sm:$0xff] }
 0x38b   :  { %1516 = vmatpush1.bf16.msra.mxu1 %v2580_v2  ;;  %v620_v27 = vmul.f32 %v2095_v51, %v593_v31  ;;  %v590_v21 = vsel %vm588_vm5, %v2015_v6, %v2023_v33  ;;  %v623_v12 = vmul.f32 %v2105_v11, %v595_v16  ;;  %v701_v30 = vpop.permute.xlu1 %700  ;;  %v1483_v7 = vpack.c.bf16 %v552_v5, %v548_v13  ;;  %v2260_v63 = vpop.permute.xlu0 %774  ;;  %v2591_v16 = vld [vmem:[#allocation7_spill] sm:$0xff] }
 0x38c   :  { %1480 = vmatpush1.bf16.msra.mxu0 %v2583_v55  ;;  %1518 = vmatprep.subr.bf16.mxu1 %v1517_v62  ;;  %v625_v39 = vmul.f32 %v2092_v56, %v592_v19  ;;  %v743_v35 = vrot.slane %v1451_v59, %v1872_v54  ;;  %v2234_v38 = vrot.slane %v2209_v28, %v1742_v14  ;;  %v2584_v56 = vld [vmem:[#allocation10_spill] sm:$0xff]  ;;  %v2585_v59 = vld [vmem:[#allocation8_spill] sm:$0xff] }
 0x38d   :  { %1482 = vmatprep.subr.bf16.mxu0 %v1481_v57  ;;  %v624_v49 = vmul.f32 %v2095_v51, %v594_v8  ;;  %v627_v60 = vmul.f32 %v2105_v11, %v596_v50  ;;  %v622_v61 = vmul.f32 %v2098_v18, %v589_v1  ;;  %v659_v6 = vsel %vm652_vm6, %v2085_v29, %v2037_v58  ;;  %v2593_v1 = vld [vmem:[#allocation4_spill] sm:$0xff] }
 0x38e   :  { %v626_v33 = vmul.f32 %v2098_v18, %v590_v21  ;;  %v655_v14 = vsel %vm652_vm6, %v2585_v59, %v2584_v56  ;;  %v2586_v51 = vpack.c.bf16 %v1773_v41, %v1781_v23  ;;  %v1489_v11 = vpack.c.bf16 %v625_v39, %v621_v3  ;;  %v2587_v18 = vld [vmem:[#allocation11_spill] sm:$0xff]  ;;  %v2590_v23 = vld [vmem:[#allocation9_spill] sm:$0xff]  ;;  %v2597_v21 = vld [vmem:[#allocation14_spill] sm:$0xff] }
 0x38f   :  { %1520 = vmatpush1.bf16.msra.mxu1 %v1519_v24  ;;  %v1491_v0 = vpack.c.bf16 %v624_v49, %v620_v27  ;;  %v657_v5 = vsel %vm652_vm6, %v2037_v58, %v2585_v59  ;;  %v660_v52 = vsel %vm652_vm6, %v2588_v42, %v2587_v18  ;;  %v713_v13 = vpop.permute.xlu1 %712  ;;  %v2589_v31 = vpack.c.bf16 %v1797_v48, %v1771_v40  ;;  %v2596_v24 = vld [vmem:[#allocation15_spill] sm:$0xff] }
 0x390   :  { %1484 = vmatpush1.bf16.msra.mxu0 %v1483_v7  ;;  %1522 = vmatprep.subr.bf16.mxu1 %v2586_v51  ;;  %v1525_v41 = vpack.c.bf16 %v627_v60, %v623_v12  ;;  %v656_v62 = vsel %vm652_vm6, %v2591_v16, %v2590_v23  ;;  %v658_v58 = vsel %vm652_vm6, %v2587_v18, %v2591_v16  ;;  %v2598_v12 = vld [vmem:[#allocation13_spill] sm:$0xff] }
 0x391   :  { %1486 = vmatprep.subr.bf16.mxu0 %v2589_v31  ;;  %v653_v53 = vsel %vm652_vm6, %v2584_v56, %v2085_v29  ;;  %v687_v19 = vmul.f32 %v2131_v4, %v659_v6  ;;  %v1527_v40 = vpack.c.bf16 %v626_v33, %v622_v61  ;;  %v685_v48 = vmul.f32 %v2112_v37, %v655_v14  ;;  %v767_v6 = vpop.permute.xlu0 %766 }
 0x392   :  { %v654_v8 = vsel %vm652_vm6, %v2590_v23, %v2588_v42  ;;  %v723_v2 = vsel %vm716_vm7, %v713_v13, %v701_v30  ;;  %v2592_v57 = vpack.c.bf16 %v1783_v45, %v1790_v17  ;;  %v684_v3 = vmul.f32 %v2115_v44, %v657_v5 }
 0x393   :  { %v691_v29 = vmul.f32 %v2131_v4, %v660_v52  ;;  %v719_v50 = vsel %vm716_vm7, %v2133_v10, %v2180_v20  ;;  %v2595_v43 = vpack.c.bf16 %v2593_v1, %v2594_v25  ;;  %v689_v55 = vmul.f32 %v2112_v37, %v656_v62  ;;  %v769_v27 = vpop.permute.xlu1 %768 }
 0x394   :  { %1524 = vmatpush1.bf16.msra.mxu1 %v2592_v57  ;;  %v688_v45 = vmul.f32 %v2115_v44, %v658_v58  ;;  %v686_v17 = vmul.f32 %v2128_v15, %v653_v53  ;;  %v724_v4 = vsel %vm716_vm7, %v2138_v47, %v2596_v24  ;;  %v720_v7 = vsel %vm716_vm7, %v2598_v12, %v2597_v21 }
 0x395   :  { %1488 = vmatpush1.bf16.msra.mxu0 %v2595_v43  ;;  %1526 = vmatprep.subr.bf16.mxu1 %v1525_v41  ;;  %v717_v37 = vsel %vm716_vm7, %v2180_v20, %v713_v13  ;;  %v751_v39 = vmul.f32 %v743_v35, %v723_v2  ;;  %v1529_v44 = vpack.c.bf16 %v691_v29, %v687_v19  ;;  %v779_v23 = vpop.permute.xlu0 %778  ;;  %v2599_v1 = vmov 0.0  }
 0x396   :  { %1490 = vmatprep.subr.bf16.mxu0 %v1489_v11  ;;  %v690_v49 = vmul.f32 %v2128_v15, %v654_v8  ;;  %v749_v60 = vmul.f32 %v2157_v36, %v719_v50  ;;  %v721_v61 = vsel %vm716_vm7, %v701_v30, %v2133_v10  ;;  %v1493_v33 = vpack.c.bf16 %v689_v55, %v685_v48  ;;  %v831_v50 = vld [vmem:[%s2540_s2 + $0x18] sm:$0xff] }
 0x397   :  { %v1495_v56 = vpack.c.bf16 %v688_v45, %v684_v3  ;;  %v718_v59 = vsel %vm716_vm7, %v2597_v21, %v2138_v47  ;;  %v755_v20 = vmul.f32 %v743_v35, %v724_v4  ;;  %v753_v15 = vmul.f32 %v2157_v36, %v720_v7  ;;  %v773_v51 = vpop.permute.xlu1 %772 }
 0x398   :  { %1528 = vmatpush1.bf16.msra.mxu1 %v1527_v40  ;;  %v1531_v14 = vpack.c.bf16 %v690_v49, %v686_v17  ;;  %v722_v10 = vsel %vm716_vm7, %v2596_v24, %v2598_v12  ;;  %v750_v30 = vmul.f32 %v2171_v46, %v717_v37  ;;  %v748_v11 = vmul.f32 %v2160_v34, %v721_v61 }
 0x399   :  { %1492 = vmatpush1.bf16.msra.mxu0 %v1491_v0  ;;  %1530 = vmatprep.subr.bf16.mxu1 %v1529_v44  ;;  %v784_v47 = vsel %vm780_vm8, %v2201_v9, %v2260_v63  ;;  %v783_v36 = vsel %vm780_vm8, %v769_v27, %v773_v51  ;;  %v1533_v35 = vpack.c.bf16 %v755_v20, %v751_v39 }
 0x39a   :  { %1494 = vmatprep.subr.bf16.mxu0 %v1493_v33  ;;  %v754_v0 = vmul.f32 %v2171_v46, %v718_v59  ;;  %v795_v5 = vrot.slane %v2209_v28, %v1749_v26  ;;  %v813_v18 = vmul.f32 %v2234_v38, %v783_v36  ;;  %v1497_v42 = vpack.c.bf16 %v753_v15, %v749_v60 }
 0x39b   :  { %v752_v52 = vmul.f32 %v2160_v34, %v722_v10  ;;  %v786_v13 = vsel %vm780_vm8, %v767_v6, %v2201_v9  ;;  %v817_v31 = vmul.f32 %v2234_v38, %v784_v47  ;;  %v765_v46 = vpop.permute.xlu1 %764  ;;  %v803_v26 = vrot.slane %v2209_v28, %v1758_v32 }
 0x39c   :  { %1532 = vmatpush1.bf16.msra.mxu1 %v1531_v14  ;;  %v1535_v41 = vpack.c.bf16 %v754_v0, %v750_v30  ;;  %v785_v62 = vsel %vm780_vm8, %v765_v46, %v769_v27  ;;  %v816_v34 = vmul.f32 %v795_v5, %v786_v13  ;;  %v807_v58 = vrot.slane %v2209_v28, %v1872_v54 }
 0x39d   :  { %1496 = vmatpush1.bf16.msra.mxu0 %v1495_v56  ;;  %1534 = vmatprep.subr.bf16.mxu1 %v1533_v35  ;;  %v1499_v16 = vpack.c.bf16 %v752_v52, %v748_v11  ;;  %v812_v9 = vmul.f32 %v795_v5, %v785_v62  ;;  %v1501_v53 = vpack.c.bf16 %v817_v31, %v813_v18 }
 0x39e   :  { %1498 = vmatprep.subr.bf16.mxu0 %v1497_v42  ;;  %v782_v38 = vsel %vm780_vm8, %v2260_v63, %v779_v23  ;;  %v788_v19 = vsel %vm780_vm8, %v779_v23, %v767_v6  ;;  %v828_v63 = vld [vmem:[%s2540_s2] sm:$0xff] }
 0x39f   :  { %v1503_v40 = vpack.c.bf16 %v816_v34, %v812_v9  ;;  %v777_v32 = vpop.permute.xlu1 %776  ;;  %v818_v28 = vmul.f32 %v803_v26, %v782_v38  ;;  %v819_v8 = vmul.f32 %v807_v58, %v788_v19  ;;  %v1064_v9 = vld [vmem:[%s2541_s7] sm:$0xff]  ;;  %v1065_v19 = vld [vmem:[%s2541_s7 + $0x8] sm:$0xff] }
 0x3a0   :  { %1536 = vmatpush1.bf16.msra.mxu1 %v1535_v41  ;;  %v781_v48 = vsel %vm780_vm8, %v773_v51, %v777_v32  ;;  %v787_v54 = vsel %vm780_vm8, %v777_v32, %v765_v46 }
 0x3a1   :  { %1500 = vmatpush1.bf16.msra.mxu0 %v1499_v16  ;;  %v814_v2 = vmul.f32 %v803_v26, %v781_v48  ;;  %v815_v57 = vmul.f32 %v807_v58, %v787_v54  ;;  %v1067_v54 = vld [vmem:[%s2542_s8 + $0x8] sm:$0xff] }
 0x3a2   :  { %1502 = vmatprep.subr.bf16.mxu0 %v1501_v53 }
 0x3a3   :  { %v1539_v3 = vpack.c.bf16 %v818_v28, %v814_v2  ;;  %v1537_v29 = vpack.c.bf16 %v819_v8, %v815_v57  ;;  %v1066_v28 = vld [vmem:[%s2542_s8] sm:$0xff] }
 0x3a5   :  { %1504 = vmatpush1.bf16.msra.mxu0 %v1503_v40  ;;  %1538 = vmatprep.subr.bf16.mxu1 %v1537_v29 }
 0x3a6   :  { %1540 = vmatpush1.bf16.msra.mxu1 %v1539_v3 }
 0x3a8   :  { %975 = vmatmul.mubr.f32.vlgmr.msra.gmra.mrb[4].mxu0 %v828_v63 }
 0x3a9   :  { %1454 = vmatprep.mubr.msk.f32.mxu0 %vm48_vm0, %v831_v50  ;;  %1052 = vmatmul.mubr.f32.vlgmr.msra.gmra.mrb[4].mxu1 %v828_v63 }
 0x3aa   :  { %1456 = vmatprep.mubr.msk.f32.mxu1 %vm48_vm0, %v831_v50 }
 0x3ac   :  { %981 = vmatmul.mubr.f32.gmra.mrb[6].mxu0 %v830_v22 }
 0x3ad   :  { %1234 = vmatprep.mubr.f32.mxu0 %v2599_v1  ;;  %1058 = vmatmul.mubr.f32.gmra.mrb[6].mxu1 %v830_v22 }
 0x3ae   :  { %1311 = vmatprep.mubr.f32.mxu1 %v2599_v1 }
 0x47b   :  { %v2371_v25 = vpop.f32.mrb[4].mxu0 }
 0x47c   :  { %v2373_v43 = vpop.f32.mrb[5].mxu0  ;;  %v2379_v17 = vpop.f32.mrb[4].mxu1 }
 0x47d   :  { %v1068_v55 = vadd.f32 %v2373_v43, %v2371_v25  ;;  %v2383_v4 = vpop.f32.mrb[5].mxu1 }
 0x47f   :  { %v2377_v45 = vpop.f32.mrb[6].mxu0  ;;  %v1069_v27 = vadd.f32 %v1068_v55, %v2379_v17 }
 0x480   :  { %v2381_v24 = vpop.f32.mrb[7].mxu0  ;;  %v2389_v7 = vpop.f32.mrb[6].mxu1 }
 0x481   :  { %v1073_v21 = vadd.f32 %v2381_v24, %v2377_v45  ;;  %v1070_v12 = vadd.f32 %v1069_v27, %v2383_v4  ;;  %v2391_v37 = vpop.f32.mrb[7].mxu1 }
 0x483   :  { %1071 = vadd.xlane.f32.xlu1 %v1070_v12  ;;  %v1074_v39 = vadd.f32 %v1073_v21, %v2389_v7 }
 0x485   :  { %v1075_v44 = vadd.f32 %v1074_v39, %v2391_v37 }
 0x487   :  { %1076 = vadd.xlane.f32.xlu0 %v1075_v44 }
 0x510   :  { %v1072_v49 = vpop.xlane.xlu1 %1071 }
 0x511   :  { %v1078_v60 = vmul.f32 0.001953125, %v1072_v49 }
 0x513   :  { %v1080_v61 = vsub.f32 %v2371_v25, %v1078_v60  ;;  %v1081_v6 = vsub.f32 %v2373_v43, %v1078_v60  ;;  %v1082_v33 = vsub.f32 %v2379_v17, %v1078_v60  ;;  %v1083_v59 = vsub.f32 %v2383_v4, %v1078_v60 }
 0x514   :  { %v1077_v56 = vpop.xlane.xlu0 %1076 }
 0x515   :  { %v1079_v20 = vmul.f32 0.001953125, %v1077_v56  ;;  %v1088_v15 = vmul.f32 %v1080_v61, %v1080_v61  ;;  %v1089_v14 = vmul.f32 %v1081_v6, %v1081_v6  ;;  %v1090_v10 = vmul.f32 %v1082_v33, %v1082_v33 }
 0x516   :  { %v1091_v36 = vmul.f32 %v1083_v59, %v1083_v59 }
 0x517   :  { %v1096_v30 = vadd.f32 %v1089_v14, %v1088_v15  ;;  %v1084_v51 = vsub.f32 %v2377_v45, %v1079_v20  ;;  %v1085_v11 = vsub.f32 %v2381_v24, %v1079_v20  ;;  %v1086_v47 = vsub.f32 %v2389_v7, %v1079_v20 }
 0x518   :  { %v1087_v0 = vsub.f32 %v2391_v37, %v1079_v20 }
 0x519   :  { %v1097_v35 = vadd.f32 %v1096_v30, %v1090_v10  ;;  %v1092_v5 = vmul.f32 %v1084_v51, %v1084_v51  ;;  %v1093_v18 = vmul.f32 %v1085_v11, %v1085_v11  ;;  %v1094_v52 = vmul.f32 %v1086_v47, %v1086_v47  ;;  %v1162_v11 = vld [vmem:[%s2543_s4] sm:$0xff]  ;;  %v1163_v47 = vld [vmem:[%s2543_s4 + $0x8] sm:$0xff] }
 0x51a   :  { %v1095_v31 = vmul.f32 %v1087_v0, %v1087_v0 }
 0x51b   :  { %v1098_v42 = vadd.f32 %v1097_v35, %v1091_v36  ;;  %v1101_v13 = vadd.f32 %v1093_v18, %v1092_v5 }
 0x51d   :  { %1099 = vadd.xlane.f32.xlu0 %v1098_v42  ;;  %v1102_v41 = vadd.f32 %v1101_v13, %v1094_v52 }
 0x51f   :  { %v1103_v23 = vadd.f32 %v1102_v41, %v1095_v31 }
 0x521   :  { %1104 = vadd.xlane.f32.xlu1 %v1103_v23 }
 0x5aa   :  { %v1100_v46 = vpop.xlane.xlu0 %1099 }
 0x5ab   :  { %v1106_v16 = vmul.f32 0.001953125, %v1100_v46 }
 0x5ad   :  { %v1108_v26 = vadd.f32 1e-05, %v1106_v16 }
 0x5ae   :  { %v1105_v62 = vpop.xlane.xlu1 %1104 }
 0x5af   :  { %1565 = vrsqrt.f32 %v1108_v26  ;;  %v1107_v34 = vmul.f32 0.001953125, %v1105_v62 }
 0x5b1   :  { %v1109_v58 = vadd.f32 1e-05, %v1107_v34 }
 0x5b3   :  { %1567 = vrsqrt.f32 %v1109_v58 }
 0x5b9   :  { %v1566_v53 = vpop.eup %1565 }
 0x5ba   :  { %v1112_v38 = vmul.f32 %v1566_v53, %v1064_v9 }
 0x5bc   :  { %1120 = vperm.xlu0 %1559, %v1112_v38   ;;  %v1114_v48 = vmul.f32 %v1112_v38, %v1078_v60 }
 0x5bd   :  { %v1568_v40 = vpop.eup %1567 }
 0x5be   :  { %v1113_v32 = vmul.f32 %v1568_v40, %v1065_v19  ;;  %v1116_v57 = vsub.f32 %v1066_v28, %v1114_v48 }
 0x5c0   :  { %1125 = vperm.xlu1 %1560, %v1113_v32   ;;  %v1115_v8 = vmul.f32 %v1113_v32, %v1079_v20 }
 0x5c2   :  { %v1117_v2 = vsub.f32 %v1067_v54, %v1115_v8 }
 0x5c4   :  { %1143 = vperm.xlu0 %1559, %v1117_v2   ;;  %1138 = vperm.xlu1 %1560, %v1116_v57  }
 0x63b   :  { %v1121_v63 = vpop.permute.xlu0 %1120 }
 0x63c   :  { %v1128_v27 = vmul.f32 %v1121_v63, %v2371_v25  ;;  %v1129_v21 = vmul.f32 %v1121_v63, %v2373_v43  ;;  %v1130_v12 = vmul.f32 %v1121_v63, %v2379_v17  ;;  %v1131_v39 = vmul.f32 %v1121_v63, %v2383_v4 }
 0x63f   :  { %v1126_v3 = vpop.permute.xlu1 %1125 }
 0x640   :  { %v1132_v29 = vmul.f32 %v1126_v3, %v2377_v45  ;;  %v1133_v50 = vmul.f32 %v1126_v3, %v2381_v24  ;;  %v1134_v22 = vmul.f32 %v1126_v3, %v2389_v7  ;;  %v1135_v55 = vmul.f32 %v1126_v3, %v2391_v37 }
 0x643   :  { %v1144_v44 = vpop.permute.xlu0 %1143  ;;  %v1139_v49 = vpop.permute.xlu1 %1138 }
 0x644   :  { %v1150_v60 = vadd.f32 %v1144_v44, %v1132_v29  ;;  %v1151_v61 = vadd.f32 %v1144_v44, %v1133_v50  ;;  %v1152_v6 = vadd.f32 %v1144_v44, %v1134_v22  ;;  %v1153_v45 = vadd.f32 %v1144_v44, %v1135_v55 }
 0x645   :  { %v1146_v33 = vadd.f32 %v1139_v49, %v1128_v27  ;;  %v1147_v24 = vadd.f32 %v1139_v49, %v1129_v21  ;;  %v1148_v56 = vadd.f32 %v1139_v49, %v1130_v12  ;;  %v1149_v7 = vadd.f32 %v1139_v49, %v1131_v39 }
 0x646   :  { %v1158_v59 = vmax.f32 %v1150_v60, 0.0  ;;  %v1160_v37 = vmax.f32 %v1152_v6, 0.0  ;;  %v1159_v20 = vmax.f32 %v1151_v61, 0.0  ;;  %v1161_v25 = vmax.f32 %v1153_v45, 0.0 }
 0x647   :  { %v1154_v15 = vmax.f32 %v1146_v33, 0.0  ;;  %v1156_v43 = vmax.f32 %v1148_v56, 0.0  ;;  %v1155_v14 = vmax.f32 %v1147_v24, 0.0  ;;  %v1157_v17 = vmax.f32 %v1149_v7, 0.0  ;;  %v1324_v33 = vld [vmem:[%s2544_s9] sm:$0xff]  ;;  %v1325_v7 = vld [vmem:[%s2544_s9 + $0x8] sm:$0xff] }
 0x649   :  { %v1541_v10 = vpack.c.bf16 %v1159_v20, %v1155_v14  ;;  %v1545_v4 = vpack.c.bf16 %v1161_v25, %v1157_v17  ;;  %v1543_v30 = vpack.c.bf16 %v1158_v59, %v1154_v15  ;;  %v1547_v51 = vpack.c.bf16 %v1160_v37, %v1156_v43  ;;  %v1327_v25 = vld [vmem:[%s2545_s10 + $0x8] sm:$0xff]  ;;  %v1326_v15 = vld [vmem:[%s2545_s10] sm:$0xff] }
 0x64b   :  { %1542 = vmatprep.subr.bf16.mxu0 %v1541_v10  ;;  %1546 = vmatprep.subr.bf16.mxu1 %v1545_v4 }
 0x64c   :  { %1544 = vmatpush1.bf16.msra.mxu0 %v1543_v30  ;;  %1548 = vmatpush1.bf16.msra.mxu1 %v1547_v51 }
 0x64f   :  { %1457 = vmatmul.mubr.msk.f32.vlgmr.msra.gmra.mrb[8].mxu0 %vm48_vm0, %v1162_v11  ;;  %1459 = vmatmul.mubr.msk.f32.vlgmr.msra.gmra.mrb[8].mxu1 %vm48_vm0, %v1162_v11 }
 0x650   :  { %1240 = vmatprep.mubr.f32.mxu0 %v2599_v1  ;;  %1317 = vmatprep.mubr.f32.mxu1 %v2599_v1 }
 0x653   :  { %1458 = vmatmul.mubr.msk.f32.gmra.mrb[10].mxu0 %vm48_vm0, %v1163_v47  ;;  %1460 = vmatmul.mubr.msk.f32.gmra.mrb[10].mxu1 %vm48_vm0, %v1163_v47 }
 0x722   :  { %v2435_v36 = vpop.f32.mrb[8].mxu0  ;;  %v2437_v35 = vpop.f32.mrb[8].mxu1 }
 0x723   :  { %v2439_v0 = vpop.f32.mrb[9].mxu0  ;;  %v2441_v5 = vpop.f32.mrb[9].mxu1 }
 0x724   :  { %v1328_v18 = vadd.f32 %v2439_v0, %v2435_v36 }
 0x726   :  { %v2445_v42 = vpop.f32.mrb[10].mxu0  ;;  %v2447_v52 = vpop.f32.mrb[10].mxu1  ;;  %v1329_v1 = vadd.f32 %v1328_v18, %v2437_v35 }
 0x727   :  { %v2450_v13 = vpop.f32.mrb[11].mxu0  ;;  %v2452_v31 = vpop.f32.mrb[11].mxu1 }
 0x728   :  { %v1333_v41 = vadd.f32 %v2450_v13, %v2445_v42  ;;  %v1330_v23 = vadd.f32 %v1329_v1, %v2441_v5 }
 0x72a   :  { %1331 = vadd.xlane.f32.xlu1 %v1330_v23  ;;  %v1334_v46 = vadd.f32 %v1333_v41, %v2447_v52 }
 0x72c   :  { %v1335_v16 = vadd.f32 %v1334_v46, %v2452_v31 }
 0x72e   :  { %1336 = vadd.xlane.f32.xlu0 %v1335_v16 }
 0x7b7   :  { %v1332_v26 = vpop.xlane.xlu1 %1331 }
 0x7b8   :  { %v1338_v62 = vmul.f32 0.001953125, %v1332_v26 }
 0x7ba   :  { %v1340_v34 = vsub.f32 %v2435_v36, %v1338_v62  ;;  %v1341_v58 = vsub.f32 %v2439_v0, %v1338_v62  ;;  %v1342_v9 = vsub.f32 %v2437_v35, %v1338_v62  ;;  %v1343_v38 = vsub.f32 %v2441_v5, %v1338_v62 }
 0x7bb   :  { %v1337_v53 = vpop.xlane.xlu0 %1336 }
 0x7bc   :  { %v1339_v19 = vmul.f32 0.001953125, %v1337_v53  ;;  %v1348_v40 = vmul.f32 %v1340_v34, %v1340_v34  ;;  %v1349_v32 = vmul.f32 %v1341_v58, %v1341_v58  ;;  %v1350_v48 = vmul.f32 %v1342_v9, %v1342_v9 }
 0x7bd   :  { %v1351_v57 = vmul.f32 %v1343_v38, %v1343_v38  ;;  %v1576_v38 = vld [vmem:[%s2535_s0 + $0x38] sm:$0xff] }
 0x7be   :  { %v1356_v54 = vadd.f32 %v1349_v32, %v1348_v40  ;;  %v1344_v28 = vsub.f32 %v2445_v42, %v1339_v19  ;;  %v1345_v8 = vsub.f32 %v2450_v13, %v1339_v19  ;;  %v1346_v2 = vsub.f32 %v2447_v52, %v1339_v19  ;;  %v1577_v40 = vld [vmem:[%s2535_s0] sm:$0xff] }
 0x7bf   :  { %v1347_v3 = vsub.f32 %v2452_v31, %v1339_v19 }
 0x7c0   :  { %v1357_v63 = vadd.f32 %v1356_v54, %v1350_v48  ;;  %v1352_v29 = vmul.f32 %v1344_v28, %v1344_v28  ;;  %v1353_v50 = vmul.f32 %v1345_v8, %v1345_v8  ;;  %v1354_v55 = vmul.f32 %v1346_v2, %v1346_v2  ;;  %v1578_v48 = vld [vmem:[%s2535_s0 + $0x8] sm:$0xff]  ;;  %v1579_v28 = vld [vmem:[%s2535_s0 + $0x10] sm:$0xff]  ;;  %v1580_v2 = vld [vmem:[%s2535_s0 + $0x18] sm:$0xff] }
 0x7c1   :  { %v1355_v21 = vmul.f32 %v1347_v3, %v1347_v3 }
 0x7c2   :  { %v1358_v22 = vadd.f32 %v1357_v63, %v1351_v57  ;;  %v1361_v27 = vadd.f32 %v1353_v50, %v1352_v29 }
 0x7c4   :  { %1359 = vadd.xlane.f32.xlu0 %v1358_v22  ;;  %v1362_v12 = vadd.f32 %v1361_v27, %v1354_v55 }
 0x7c6   :  { %v1363_v39 = vadd.f32 %v1362_v12, %v1355_v21 }
 0x7c8   :  { %1364 = vadd.xlane.f32.xlu1 %v1363_v39 }
 0x851   :  { %v1360_v44 = vpop.xlane.xlu0 %1359 }
 0x852   :  { %v1366_v49 = vmul.f32 0.001953125, %v1360_v44 }
 0x854   :  { %v1368_v60 = vadd.f32 1e-05, %v1366_v49 }
 0x855   :  { %v1365_v61 = vpop.xlane.xlu1 %1364 }
 0x856   :  { %1569 = vrsqrt.f32 %v1368_v60  ;;  %v1367_v6 = vmul.f32 0.001953125, %v1365_v61 }
 0x858   :  { %v1369_v45 = vadd.f32 1e-05, %v1367_v6 }
 0x85a   :  { %1571 = vrsqrt.f32 %v1369_v45 }
 0x860   :  { %v1570_v24 = vpop.eup %1569 }
 0x861   :  { %v1372_v56 = vmul.f32 %v1570_v24, %v1324_v33 }
 0x863   :  { %1380 = vperm.xlu0 %1559, %v1372_v56   ;;  %v1374_v20 = vmul.f32 %v1372_v56, %v1338_v62 }
 0x864   :  { %v1572_v59 = vpop.eup %1571 }
 0x865   :  { %v1373_v37 = vmul.f32 %v1572_v59, %v1325_v7  ;;  %v1376_v17 = vsub.f32 %v1326_v15, %v1374_v20 }
 0x867   :  { %1385 = vperm.xlu1 %1560, %v1373_v37   ;;  %v1375_v43 = vmul.f32 %v1373_v37, %v1339_v19 }
 0x869   :  { %v1377_v14 = vsub.f32 %v1327_v25, %v1375_v43 }
 0x86b   :  { %1403 = vperm.xlu0 %1559, %v1377_v14   ;;  %1398 = vperm.xlu1 %1560, %v1376_v17  }
 0x8e2   :  { %v1381_v10 = vpop.permute.xlu0 %1380 }
 0x8e3   :  { %v1388_v1 = vmul.f32 %v1381_v10, %v2435_v36  ;;  %v1389_v41 = vmul.f32 %v1381_v10, %v2439_v0  ;;  %v1390_v23 = vmul.f32 %v1381_v10, %v2437_v35  ;;  %v1391_v46 = vmul.f32 %v1381_v10, %v2441_v5  ;;  %v1574_v35 = vld [vmem:[%s2535_s0 + $0x28] sm:$0xff]  ;;  %v1575_v5 = vld [vmem:[%s2535_s0 + $0x30] sm:$0xff] }
 0x8e6   :  { %v1386_v4 = vpop.permute.xlu1 %1385 }
 0x8e7   :  { %v1392_v30 = vmul.f32 %v1386_v4, %v2445_v42  ;;  %v1393_v51 = vmul.f32 %v1386_v4, %v2450_v13  ;;  %v1394_v11 = vmul.f32 %v1386_v4, %v2447_v52  ;;  %v1395_v47 = vmul.f32 %v1386_v4, %v2452_v31  ;;  %v1573_v31 = vld [vmem:[%s2535_s0 + $0x20] sm:$0xff] }
 0x8ea   :  { %v1404_v18 = vpop.permute.xlu0 %1403  ;;  %v1399_v16 = vpop.permute.xlu1 %1398 }
 0x8eb   :  { %v1410_v26 = vadd.f32 %v1404_v18, %v1392_v30  ;;  %v1411_v62 = vadd.f32 %v1404_v18, %v1393_v51  ;;  %v1412_v34 = vadd.f32 %v1404_v18, %v1394_v11  ;;  %v1413_v42 = vadd.f32 %v1404_v18, %v1395_v47 }
 0x8ec   :  { %v1406_v58 = vadd.f32 %v1399_v16, %v1388_v1  ;;  %v1407_v13 = vadd.f32 %v1399_v16, %v1389_v41  ;;  %v1408_v9 = vadd.f32 %v1399_v16, %v1390_v23  ;;  %v1409_v52 = vadd.f32 %v1399_v16, %v1391_v46 }
 0x8ed   :  { %v1418_v36 = vadd.f32 %v1573_v31, %v1410_v26  ;;  %v1419_v0 = vadd.f32 %v1574_v35, %v1411_v62  ;;  %v1420_v53 = vadd.f32 %v1575_v5, %v1412_v34  ;;  %v1421_v19 = vadd.f32 %v1576_v38, %v1413_v42 }
 0x8ee   :  { %v1414_v32 = vadd.f32 %v1577_v40, %v1406_v58  ;;  %v1415_v54 = vadd.f32 %v1578_v48, %v1407_v13  ;;  %v1416_v8 = vadd.f32 %v1579_v28, %v1408_v9  ;;  %v1417_v57 = vadd.f32 %v1580_v2, %v1409_v52 }
 0x8ef   :  { %v1426_v63 = vmax.f32 %v1418_v36, 0.0  ;;  %v1427_v3 = vmax.f32 %v1419_v0, 0.0  ;;  %v1428_v29 = vmax.f32 %v1420_v53, 0.0  ;;  %v1429_v50 = vmax.f32 %v1421_v19, 0.0 }
 0x8f0   :  { %v1422_v22 = vmax.f32 %v1414_v32, 0.0  ;;  %v1423_v55 = vmax.f32 %v1415_v54, 0.0  ;;  %v1424_v27 = vmax.f32 %v1416_v8, 0.0  ;;  %v1425_v21 = vmax.f32 %v1417_v57, 0.0 }
 0x8f1   :  { %1434 = vst [vmem:[%s2546_s11 + $0x20] sm:$0xff] %v1426_v63  ;;  %1435 = vst [vmem:[%s2546_s11 + $0x28] sm:$0xff] %v1427_v3 }
 0x8f2   :  { %1436 = vst [vmem:[%s2546_s11 + $0x30] sm:$0xff] %v1428_v29  ;;  %1437 = vst [vmem:[%s2546_s11 + $0x38] sm:$0xff] %v1429_v50 }
 0x8f3   :  { %1430 = vst [vmem:[%s2546_s11] sm:$0xff] %v1422_v22  ;;  %1431 = vst [vmem:[%s2546_s11 + $0x8] sm:$0xff] %v1423_v55 }
 0x8f4   :  { %1432 = vst [vmem:[%s2546_s11 + $0x10] sm:$0xff] %v1424_v27  ;;  %1433 = vst [vmem:[%s2546_s11 + $0x18] sm:$0xff] %v1425_v21 }

</bundles_post_ra>
